<compile_context>
chip_gen: v7x
topology: tpu7x:2x2x1
jax: 0.10.0
libtpu: 0.0.40
codegen_flags: <defaults>
</compile_context>

<pallas_src>
import functools

import jax
import jax.numpy as jnp
from jax import lax
from jax.experimental import pallas as pl
from jax.experimental.pallas import tpu as pltpu


def transformer_block_kernel(
    x_ref,                      # (S, D)  full-sequence rows for this batch element
    ln1_g_ref, ln1_b_ref,       # (1, D)
    wq_ref, bq_ref,             # (D, D), (1, D)    scale folded in on the host
    wkv_ref, bkv_ref,           # (D, 2D), (1, 2D)  [K | V] fused
    wo_ref, bo_ref,             # (D, D), (1, D)
    ln2_g_ref, ln2_b_ref,       # (1, D)
    w1_ref, b1_ref,             # (D, 4D), (1, 4D)
    w2_ref, b2_ref,             # (4D, D), (1, D)
    o_ref,                      # (tS, D)  row tile of the output
    k_scratch, v_scratch,       # (S, D)   lane-dense K/V cache for this batch element
    attn_scratch,               # (tS, D)  per-head outputs at their lane offsets
    *, nhead: int, approx_recip: bool,
):
  eps = 1e-5
  cdt = wq_ref.dtype            # MXU operand dtype (bf16 or f32)
  qt = pl.program_id(1)
  S, D = x_ref.shape
  tS = o_ref.shape[0]
  hd = D // nhead

  def layer_norm(v, g_ref, b_ref):
    mu = jnp.mean(v, axis=-1, keepdims=True)
    var = jnp.mean((v - mu) ** 2, axis=-1, keepdims=True)
    return (v - mu) * lax.rsqrt(var + eps) * g_ref[...] + b_ref[...]

  # ---- K/V cache: built once per batch element (qt == 0), chunked over S so the LN /
  #      projection temporaries stay one tile big.  Full-width (tS,D)x(D,2D) matmuls. ----
  @pl.when(qt == 0)
  def _():
    def kv_chunk(c, carry):
      off = pl.multiple_of(c * tS, tS)
      xc = x_ref[pl.ds(off, tS), :].astype(jnp.float32)
      ac = layer_norm(xc, ln1_g_ref, ln1_b_ref).astype(cdt)
      kv = jnp.dot(ac, wkv_ref[...],
                   preferred_element_type=jnp.float32) + bkv_ref[...]   # (tS, 2D)
      k_scratch[pl.ds(off, tS), :] = kv[:, :D].astype(cdt)
      v_scratch[pl.ds(off, tS), :] = kv[:, D:].astype(cdt)
      return carry
    lax.fori_loop(0, S // tS, kv_chunk, 0)

  # ---- Row tile: LN1 -> full-width Q proj -> per-head attention -> fused out-proj ----
  row0 = pl.multiple_of(qt * tS, tS)
  x_t = x_ref[pl.ds(row0, tS), :].astype(jnp.float32)                   # (tS, D)
  a_t = layer_norm(x_t, ln1_g_ref, ln1_b_ref).astype(cdt)

  q_full = (jnp.dot(a_t, wq_ref[...], preferred_element_type=jnp.float32)
            + bq_ref[...]).astype(cdt)                                  # (tS, D), pre-scaled

  # Static head loop: slices are static and lane-aligned when hd % 128 == 0 (the common
  # production case, e.g. D=1024 / 8 heads).  Each head's output lands at its lane offset
  # in attn_scratch, so the out-projection below is a single full-width matmul.
  for h in range(nhead):
    lo = h * hd
    qh = q_full[:, lo:lo + hd]                                          # (tS, hd)
    kh = k_scratch[:, lo:lo + hd]                                       # (S, hd)
    vh = v_scratch[:, lo:lo + hd]                                       # (S, hd)
    # scores: contract the head dim directly (no K transpose on the XLU)
    s = lax.dot_general(qh, kh, (((1,), (1,)), ((), ())),
                        preferred_element_type=jnp.float32)             # (tS, S)
    s = s - jnp.max(s, axis=-1, keepdims=True)
    p = jnp.exp(s)
    denom = jnp.sum(p, axis=-1, keepdims=True)
    oh = jnp.dot(p.astype(cdt), vh, preferred_element_type=jnp.float32)  # (tS, hd)
    # normalization deferred past the PV matmul: (tS, hd) muls instead of (tS, S)
    if approx_recip:
      oh = oh * pl.reciprocal(denom, approx=True)
    else:
      oh = oh / denom
    attn_scratch[:, lo:lo + hd] = oh.astype(cdt)

  attn = (jnp.dot(attn_scratch[...], wo_ref[...],
                  preferred_element_type=jnp.float32) + bo_ref[...])    # (tS, D)

  x_res = x_t + attn            # drop_attn: identity in eval mode

  # ---- LN2 -> Linear(D,4D) -> exact GELU -> Linear(4D,D) -> residual ----
  m = layer_norm(x_res, ln2_g_ref, ln2_b_ref).astype(cdt)
  h1 = jnp.dot(m, w1_ref[...], preferred_element_type=jnp.float32) + b1_ref[...]
  h1 = 0.5 * h1 * (1.0 + lax.erf(h1 * (1.0 / jnp.sqrt(jnp.float32(2.0)))))
  h2 = jnp.dot(h1.astype(cdt), w2_ref[...],
               preferred_element_type=jnp.float32) + b2_ref[...]

  o_ref[...] = (x_res + h2).astype(o_ref.dtype)


def _prepare_params(params, nhead, mxu_dtype):
  """Host-side weight rearrangement (PyTorch layout -> kernel layout).

  All transposes / concatenations / the 1/sqrt(hd) scale fold happen ONCE here,
  never inside the kernel.  Matmul weights are stored in the MXU operand dtype;
  LayerNorm params and biases stay f32.
  """
  (ln1_g, ln1_b, w_in, b_in, w_out, b_out,
   ln2_g, ln2_b, w_fc1, b_fc1, w_fc2, b_fc2) = params
  D = w_out.shape[0]
  hd = D // nhead
  f32 = jnp.float32
  scale = 1.0 / float(hd) ** 0.5
  b_in = jnp.reshape(b_in, (-1,))

  wq = (w_in[:D].T * scale).astype(mxu_dtype)                          # (D, D)
  bq = (b_in[:D] * scale).reshape(1, D).astype(f32)
  wkv = jnp.concatenate([w_in[D:2 * D].T, w_in[2 * D:].T], axis=1).astype(mxu_dtype)  # (D, 2D)
  bkv = jnp.concatenate([b_in[D:2 * D], b_in[2 * D:]]).reshape(1, 2 * D).astype(f32)
  wo = w_out.T.astype(mxu_dtype)                                       # (D, D)
  bo = jnp.reshape(b_out, (1, D)).astype(f32)
  w1 = w_fc1.T.astype(mxu_dtype)                                       # (D, 4D)
  b1 = jnp.reshape(b_fc1, (1, -1)).astype(f32)
  w2 = w_fc2.T.astype(mxu_dtype)                                       # (4D, D)
  b2 = jnp.reshape(b_fc2, (1, -1)).astype(f32)

  return [jnp.reshape(ln1_g, (1, D)).astype(f32), jnp.reshape(ln1_b, (1, D)).astype(f32),
          wq, bq, wkv, bkv, wo, bo,
          jnp.reshape(ln2_g, (1, D)).astype(f32), jnp.reshape(ln2_b, (1, D)).astype(f32),
          w1, b1, w2, b2]


def transformer_block(x, params, nhead, *, block_s=None, mxu_dtype=jnp.bfloat16,
                      vmem_limit_bytes=None):
  """x: (B, S, D) float32.  params: PyTorch-layout weights (see __main__)."""
  B, S, D = x.shape
  assert D % nhead == 0
  if block_s is None:
    block_s = next((c for c in (256, 128, 64, 32, 16, 8) if S % c == 0), S)
  assert S % block_s == 0 and block_s % 8 == 0, "seq tile must divide S, multiple of 8"
  n_qt = S // block_s

  kparams = _prepare_params(params, nhead, mxu_dtype)

  # Constant-index weights: single-buffered.  Double-buffering buys nothing (index never
  # changes) and would double the resident-weight VMEM footprint (critical on v7x, 64 MiB).
  def weight_spec(p):
    nd = p.ndim
    return pl.BlockSpec(p.shape, lambda b, t, _nd=nd: (0,) * _nd,
                        pipeline_mode=pl.Buffered(1))

  # Full-sequence x: one single-buffered resident copy per batch element; the row tile is
  # sliced out of it in-kernel (no second, double-buffered x stream riding every tile).
  x_spec = pl.BlockSpec((None, S, D), lambda b, t: (b, 0, 0),
                        pipeline_mode=pl.Buffered(1))

  # VMEM budget derived from the actual footprint (single-buffered weights + lane-dense
  # K/V scratch + resident x + working tiles), clamped to fit every current chip.
  itemsize = jnp.dtype(mxu_dtype).itemsize
  weight_bytes = sum(int(p.size) * p.dtype.itemsize for p in kparams)
  scratch_bytes = (2 * S * D + block_s * D) * itemsize
  resident_bytes = S * D * x.dtype.itemsize + 2 * block_s * D * x.dtype.itemsize
  work_bytes = 6 * block_s * max(S, 4 * D) * 4
  if vmem_limit_bytes is None:
    vmem_limit_bytes = int(min(max(
        1.5 * (weight_bytes + scratch_bytes + resident_bytes + work_bytes),
        32 << 20), 100 << 20))

  flops = int(B * (24 * S * D * D + 4 * S * S * D))
  transcendentals = int(B * (nhead * S * S + 4 * S * D))
  bytes_accessed = int(2 * B * S * D * 4 + weight_bytes)

  kernel = functools.partial(
      transformer_block_kernel, nhead=nhead,
      approx_recip=(jnp.dtype(mxu_dtype) != jnp.dtype(jnp.float32)))

  return pl.pallas_call(
      kernel,
      out_shape=jax.ShapeDtypeStruct((B, S, D), x.dtype),
      grid=(B, n_qt),
      in_specs=[x_spec] + [weight_spec(p) for p in kparams],
      out_specs=pl.BlockSpec((None, block_s, D), lambda b, t: (b, t, 0)),
      scratch_shapes=[pltpu.VMEM((S, D), mxu_dtype),        # K cache (lane-dense)
                      pltpu.VMEM((S, D), mxu_dtype),        # V cache (lane-dense)
                      pltpu.VMEM((block_s, D), mxu_dtype)], # concat(head outputs)
      compiler_params=pltpu.CompilerParams(
          # seq-tile axis MUST stay sequential ("arbitrary"): K/V scratch is filled at
          # qt == 0 and reused by the remaining tiles of the same batch element.
          dimension_semantics=("parallel", "arbitrary"),
          vmem_limit_bytes=vmem_limit_bytes),
      cost_estimate=pl.CostEstimate(flops=flops,
                                    transcendentals=transcendentals,
                                    bytes_accessed=bytes_accessed),
  )(x, *kparams)


def reference_block(x, params, nhead):
  """Pure-JAX f32 reference with PyTorch-equivalent math."""
  (ln1_g, ln1_b, w_in, b_in, w_out, b_out,
   ln2_g, ln2_b, w_fc1, b_fc1, w_fc2, b_fc2) = params
  eps = 1e-5
  B, S, D = x.shape
  hd = D // nhead

  def ln(t, g, b):
    mu = jnp.mean(t, axis=-1, keepdims=True)
    var = jnp.mean((t - mu) ** 2, axis=-1, keepdims=True)
    return (t - mu) / jnp.sqrt(var + eps) * g + b

  a = ln(x, ln1_g, ln1_b)
  qkv = a @ w_in.T + b_in
  q, k, v = jnp.split(qkv, 3, axis=-1)
  q = q.reshape(B, S, nhead, hd).transpose(0, 2, 1, 3)
  k = k.reshape(B, S, nhead, hd).transpose(0, 2, 1, 3)
  v = v.reshape(B, S, nhead, hd).transpose(0, 2, 1, 3)
  s = jnp.einsum("bhqd,bhkd->bhqk", q, k) / jnp.sqrt(jnp.float32(hd))
  p = jax.nn.softmax(s, axis=-1)
  o = jnp.einsum("bhqk,bhkd->bhqd", p, v).transpose(0, 2, 1, 3).reshape(B, S, D)
  attn_out = o @ w_out.T + b_out
  x = x + attn_out
  m = ln(x, ln2_g, ln2_b)
  h1 = m @ w_fc1.T + b_fc1
  h1 = jax.nn.gelu(h1, approximate=False)
  return x + (h1 @ w_fc2.T + b_fc2)


if __name__ == "__main__":
  # Small, lane-dense demo shapes: D multiple of 128, S multiple of 8,
  # 2 seq tiles of 8 rows to exercise the (batch, seq-tile) grid + K/V caching.
  B, S, D, H = 2, 16, 128, 4

  key = jax.random.PRNGKey(0)
  ks = jax.random.split(key, 13)

  def nrm(k, shape, scale=0.02):
    return (scale * jax.random.normal(k, shape)).astype(jnp.float32)

  ln1_g = 1.0 + nrm(ks[0], (1, D), 0.1)
  ln1_b = nrm(ks[1], (1, D), 0.1)
  w_in = nrm(ks[2], (3 * D, D))       # PyTorch in_proj_weight layout
  b_in = nrm(ks[3], (1, 3 * D))
  w_out = nrm(ks[4], (D, D))          # PyTorch out_proj.weight layout
  b_out = nrm(ks[5], (1, D))
  ln2_g = 1.0 + nrm(ks[6], (1, D), 0.1)
  ln2_b = nrm(ks[7], (1, D), 0.1)
  w_fc1 = nrm(ks[8], (4 * D, D))      # PyTorch Linear weight layout
  b_fc1 = nrm(ks[9], (1, 4 * D))
  w_fc2 = nrm(ks[10], (D, 4 * D))
  b_fc2 = nrm(ks[11], (1, D))

  params = [ln1_g, ln1_b, w_in, b_in, w_out, b_out,
            ln2_g, ln2_b, w_fc1, b_fc1, w_fc2, b_fc2]

  x = jax.random.normal(ks[12], (B, S, D), dtype=jnp.float32)

  ref = reference_block(x, params, H)

  # f32 MXU operands + exact softmax normalization: tight correctness check.
  out_f32 = jax.block_until_ready(
      transformer_block(x, params, H, block_s=8, mxu_dtype=jnp.float32))
  assert out_f32.shape == (B, S, D)
  assert jnp.allclose(out_f32, ref, atol=2e-3, rtol=2e-3), "f32 mismatch vs reference"

  # bf16 MXU operands with f32 accumulation (perf config for v6e/v7x): loose check.
  out_bf16 = jax.block_until_ready(
      transformer_block(x, params, H, block_s=8, mxu_dtype=jnp.bfloat16))
  assert out_bf16.shape == (B, S, D)
  assert jnp.allclose(out_bf16, ref, atol=3e-2, rtol=3e-2), "bf16 mismatch vs reference"

  print("KERNEL_OK")
</pallas_src>

<mosaic_0001>
module attributes {stable_mosaic.version = 11 : i64} {
  func.func @transformer_block_kernel(%arg0: i32, %arg1: i32, %arg2: memref<1x16x128xf32, #tpu.memory_space<vmem>>, %arg3: memref<1x128xf32, #tpu.memory_space<vmem>>, %arg4: memref<1x128xf32, #tpu.memory_space<vmem>>, %arg5: memref<128x128xf32, #tpu.memory_space<vmem>>, %arg6: memref<1x128xf32, #tpu.memory_space<vmem>>, %arg7: memref<128x256xf32, #tpu.memory_space<vmem>>, %arg8: memref<1x256xf32, #tpu.memory_space<vmem>>, %arg9: memref<128x128xf32, #tpu.memory_space<vmem>>, %arg10: memref<1x128xf32, #tpu.memory_space<vmem>>, %arg11: memref<1x128xf32, #tpu.memory_space<vmem>>, %arg12: memref<1x128xf32, #tpu.memory_space<vmem>>, %arg13: memref<128x512xf32, #tpu.memory_space<vmem>>, %arg14: memref<1x512xf32, #tpu.memory_space<vmem>>, %arg15: memref<512x128xf32, #tpu.memory_space<vmem>>, %arg16: memref<1x128xf32, #tpu.memory_space<vmem>>, %arg17: memref<1x8x128xf32, #tpu.memory_space<vmem>>, %arg18: memref<16x128xf32, #tpu.memory_space<vmem>>, %arg19: memref<16x128xf32, #tpu.memory_space<vmem>>, %arg20: memref<8x128xf32, #tpu.memory_space<vmem>>) attributes {dimension_semantics = [#tpu.dimension_semantics<parallel>, #tpu.dimension_semantics<arbitrary>], iteration_bounds = array<i64: 2, 2>, scalar_prefetch = 0 : i64, scratch_operands = 3 : i64, tpu.core_type = #tpu.core_type<tc>, window_params = [{pipeline_mode = #tpu.pipeline_mode<synchronous>, transform_indices = @transform_0, window_bounds = array<i64: 1, 16, 128>}, {pipeline_mode = #tpu.pipeline_mode<synchronous>, transform_indices = @transform_1, window_bounds = array<i64: 1, 128>}, {pipeline_mode = #tpu.pipeline_mode<synchronous>, transform_indices = @transform_2, window_bounds = array<i64: 1, 128>}, {pipeline_mode = #tpu.pipeline_mode<synchronous>, transform_indices = @transform_3, window_bounds = array<i64: 128, 128>}, {pipeline_mode = #tpu.pipeline_mode<synchronous>, transform_indices = @transform_4, window_bounds = array<i64: 1, 128>}, {pipeline_mode = #tpu.pipeline_mode<synchronous>, transform_indices = @transform_5, window_bounds = array<i64: 128, 256>}, {pipeline_mode = #tpu.pipeline_mode<synchronous>, transform_indices = @transform_6, window_bounds = array<i64: 1, 256>}, {pipeline_mode = #tpu.pipeline_mode<synchronous>, transform_indices = @transform_7, window_bounds = array<i64: 128, 128>}, {pipeline_mode = #tpu.pipeline_mode<synchronous>, transform_indices = @transform_8, window_bounds = array<i64: 1, 128>}, {pipeline_mode = #tpu.pipeline_mode<synchronous>, transform_indices = @transform_9, window_bounds = array<i64: 1, 128>}, {pipeline_mode = #tpu.pipeline_mode<synchronous>, transform_indices = @transform_10, window_bounds = array<i64: 1, 128>}, {pipeline_mode = #tpu.pipeline_mode<synchronous>, transform_indices = @transform_11, window_bounds = array<i64: 128, 512>}, {pipeline_mode = #tpu.pipeline_mode<synchronous>, transform_indices = @transform_12, window_bounds = array<i64: 1, 512>}, {pipeline_mode = #tpu.pipeline_mode<synchronous>, transform_indices = @transform_13, window_bounds = array<i64: 512, 128>}, {pipeline_mode = #tpu.pipeline_mode<synchronous>, transform_indices = @transform_14, window_bounds = array<i64: 1, 128>}, {transform_indices = @transform_15, window_bounds = array<i64: 1, 8, 128>}]} {
    %c0_i32 = arith.constant 0 : i32
    %0 = arith.cmpi eq, %arg1, %c0_i32 : i32
    %1 = arith.extui %0 : i1 to i32
    %c0_i32_0 = arith.constant 0 : i32
    %2 = arith.cmpi ne, %1, %c0_i32_0 : i32
    scf.if %2 {
      %c0_i32_85 = arith.constant 0 : i32
      %c2_i32 = arith.constant 2 : i32
      %152 = arith.addi %c0_i32_85, %c2_i32 : i32
      %c1_i32 = arith.constant 1 : i32
      scf.for %arg21 = %c0_i32_85 to %152 step %c1_i32  : i32 {
        %c8_i32_87 = arith.constant 8 : i32
        %153 = arith.muli %arg21, %c8_i32_87 : i32
        %154 = tpu.assume_multiple %153, 8 : i32
        %c0_88 = arith.constant 0 : index
        %155 = arith.index_cast %154 : i32 to index
        %c0_89 = arith.constant 0 : index
        %156 = vector.load %arg2[%c0_88, %155, %c0_89] : memref<1x16x128xf32, #tpu.memory_space<vmem>>, vector<1x8x128xf32>
        %157 = vector.shape_cast %156 : vector<1x8x128xf32> to vector<8x128xf32>
        %cst_90 = arith.constant dense<0.000000e+00> : vector<8xf32>
        %158 = vector.multi_reduction <add>, %157, %cst_90 [1] : vector<8x128xf32> to vector<8xf32>
        %159 = vector.shape_cast %158 : vector<8xf32> to vector<8x1xf32>
        %cst_91 = arith.constant 1.280000e+02 : f32
        %160 = vector.broadcast %cst_91 : f32 to vector<8x1xf32>
        %161 = arith.divf %159, %160 : vector<8x1xf32>
        %162 = vector.broadcast %161 : vector<8x1xf32> to vector<8x128xf32>
        %163 = arith.subf %157, %162 : vector<8x128xf32>
        %164 = arith.mulf %163, %163 : vector<8x128xf32>
        %cst_92 = arith.constant dense<0.000000e+00> : vector<8xf32>
        %165 = vector.multi_reduction <add>, %164, %cst_92 [1] : vector<8x128xf32> to vector<8xf32>
        %166 = vector.shape_cast %165 : vector<8xf32> to vector<8x1xf32>
        %cst_93 = arith.constant 1.280000e+02 : f32
        %167 = vector.broadcast %cst_93 : f32 to vector<8x1xf32>
        %168 = arith.divf %166, %167 : vector<8x1xf32>
        %169 = vector.broadcast %161 : vector<8x1xf32> to vector<8x128xf32>
        %170 = arith.subf %157, %169 : vector<8x128xf32>
        %cst_94 = arith.constant 9.99999974E-6 : f32
        %171 = vector.broadcast %cst_94 : f32 to vector<8x1xf32>
        %172 = arith.addf %168, %171 : vector<8x1xf32>
        %173 = math.rsqrt %172 : vector<8x1xf32>
        %174 = vector.broadcast %173 : vector<8x1xf32> to vector<8x128xf32>
        %175 = arith.mulf %170, %174 : vector<8x128xf32>
        %c0_95 = arith.constant 0 : index
        %c0_96 = arith.constant 0 : index
        %176 = vector.load %arg3[%c0_95, %c0_96] : memref<1x128xf32, #tpu.memory_space<vmem>>, vector<1x128xf32>
        %177 = vector.broadcast %176 : vector<1x128xf32> to vector<8x128xf32>
        %178 = arith.mulf %175, %177 : vector<8x128xf32>
        %c0_97 = arith.constant 0 : index
        %c0_98 = arith.constant 0 : index
        %179 = vector.load %arg4[%c0_97, %c0_98] : memref<1x128xf32, #tpu.memory_space<vmem>>, vector<1x128xf32>
        %180 = vector.broadcast %179 : vector<1x128xf32> to vector<8x128xf32>
        %181 = arith.addf %178, %180 : vector<8x128xf32>
        %c0_99 = arith.constant 0 : index
        %c0_100 = arith.constant 0 : index
        %182 = vector.load %arg7[%c0_99, %c0_100] : memref<128x256xf32, #tpu.memory_space<vmem>>, vector<128x256xf32>
        %cst_101 = arith.constant dense<0.000000e+00> : vector<8x256xf32>
        %183 = tpu.matmul %181, %182, %cst_101 {dimension_numbers = #tpu.dot_dimension_numbers<[1], [0], [0], [1], [0, 0, 1, 1], [], []>} : vector<8x128xf32>, vector<128x256xf32>, vector<8x256xf32> -> vector<8x256xf32>
        %c0_102 = arith.constant 0 : index
        %c0_103 = arith.constant 0 : index
        %184 = vector.load %arg8[%c0_102, %c0_103] : memref<1x256xf32, #tpu.memory_space<vmem>>, vector<1x256xf32>
        %185 = vector.broadcast %184 : vector<1x256xf32> to vector<8x256xf32>
        %186 = arith.addf %183, %185 : vector<8x256xf32>
        %187 = vector.extract_strided_slice %186 {offsets = [0, 0], sizes = [8, 128], strides = [1, 1]} : vector<8x256xf32> to vector<8x128xf32>
        %188 = arith.index_cast %154 : i32 to index
        %c0_104 = arith.constant 0 : index
        %189 = vector.load %arg18[%188, %c0_104] : memref<16x128xf32, #tpu.memory_space<vmem>>, vector<8x128xf32>
        tpu.vector_store %arg18[%188, %c0_104], %187 {strides = array<i32>} : memref<16x128xf32, #tpu.memory_space<vmem>>, vector<8x128xf32>,
        %190 = vector.extract_strided_slice %186 {offsets = [0, 128], sizes = [8, 128], strides = [1, 1]} : vector<8x256xf32> to vector<8x128xf32>
        %191 = arith.index_cast %154 : i32 to index
        %c0_105 = arith.constant 0 : index
        %192 = vector.load %arg19[%191, %c0_105] : memref<16x128xf32, #tpu.memory_space<vmem>>, vector<8x128xf32>
        tpu.vector_store %arg19[%191, %c0_105], %190 {strides = array<i32>} : memref<16x128xf32, #tpu.memory_space<vmem>>, vector<8x128xf32>,
      }
      %c2_i32_86 = arith.constant 2 : i32
    } else {
    }
    %c8_i32 = arith.constant 8 : i32
    %3 = arith.muli %arg1, %c8_i32 : i32
    %4 = tpu.assume_multiple %3, 8 : i32
    %c0 = arith.constant 0 : index
    %5 = arith.index_cast %4 : i32 to index
    %c0_1 = arith.constant 0 : index
    %6 = vector.load %arg2[%c0, %5, %c0_1] : memref<1x16x128xf32, #tpu.memory_space<vmem>>, vector<1x8x128xf32>
    %7 = vector.shape_cast %6 : vector<1x8x128xf32> to vector<8x128xf32>
    %cst = arith.constant dense<0.000000e+00> : vector<8xf32>
    %8 = vector.multi_reduction <add>, %7, %cst [1] : vector<8x128xf32> to vector<8xf32>
    %9 = vector.shape_cast %8 : vector<8xf32> to vector<8x1xf32>
    %cst_2 = arith.constant 1.280000e+02 : f32
    %10 = vector.broadcast %cst_2 : f32 to vector<8x1xf32>
    %11 = arith.divf %9, %10 : vector<8x1xf32>
    %12 = vector.broadcast %11 : vector<8x1xf32> to vector<8x128xf32>
    %13 = arith.subf %7, %12 : vector<8x128xf32>
    %14 = arith.mulf %13, %13 : vector<8x128xf32>
    %cst_3 = arith.constant dense<0.000000e+00> : vector<8xf32>
    %15 = vector.multi_reduction <add>, %14, %cst_3 [1] : vector<8x128xf32> to vector<8xf32>
    %16 = vector.shape_cast %15 : vector<8xf32> to vector<8x1xf32>
    %cst_4 = arith.constant 1.280000e+02 : f32
    %17 = vector.broadcast %cst_4 : f32 to vector<8x1xf32>
    %18 = arith.divf %16, %17 : vector<8x1xf32>
    %19 = vector.broadcast %11 : vector<8x1xf32> to vector<8x128xf32>
    %20 = arith.subf %7, %19 : vector<8x128xf32>
    %cst_5 = arith.constant 9.99999974E-6 : f32
    %21 = vector.broadcast %cst_5 : f32 to vector<8x1xf32>
    %22 = arith.addf %18, %21 : vector<8x1xf32>
    %23 = math.rsqrt %22 : vector<8x1xf32>
    %24 = vector.broadcast %23 : vector<8x1xf32> to vector<8x128xf32>
    %25 = arith.mulf %20, %24 : vector<8x128xf32>
    %c0_6 = arith.constant 0 : index
    %c0_7 = arith.constant 0 : index
    %26 = vector.load %arg3[%c0_6, %c0_7] : memref<1x128xf32, #tpu.memory_space<vmem>>, vector<1x128xf32>
    %27 = vector.broadcast %26 : vector<1x128xf32> to vector<8x128xf32>
    %28 = arith.mulf %25, %27 : vector<8x128xf32>
    %c0_8 = arith.constant 0 : index
    %c0_9 = arith.constant 0 : index
    %29 = vector.load %arg4[%c0_8, %c0_9] : memref<1x128xf32, #tpu.memory_space<vmem>>, vector<1x128xf32>
    %30 = vector.broadcast %29 : vector<1x128xf32> to vector<8x128xf32>
    %31 = arith.addf %28, %30 : vector<8x128xf32>
    %c0_10 = arith.constant 0 : index
    %c0_11 = arith.constant 0 : index
    %32 = vector.load %arg5[%c0_10, %c0_11] : memref<128x128xf32, #tpu.memory_space<vmem>>, vector<128x128xf32>
    %cst_12 = arith.constant dense<0.000000e+00> : vector<8x128xf32>
    %33 = tpu.matmul %31, %32, %cst_12 {dimension_numbers = #tpu.dot_dimension_numbers<[1], [0], [0], [1], [0, 0, 1, 1], [], []>} : vector<8x128xf32>, vector<128x128xf32>, vector<8x128xf32> -> vector<8x128xf32>
    %c0_13 = arith.constant 0 : index
    %c0_14 = arith.constant 0 : index
    %34 = vector.load %arg6[%c0_13, %c0_14] : memref<1x128xf32, #tpu.memory_space<vmem>>, vector<1x128xf32>
    %35 = vector.broadcast %34 : vector<1x128xf32> to vector<8x128xf32>
    %36 = arith.addf %33, %35 : vector<8x128xf32>
    %37 = vector.extract_strided_slice %36 {offsets = [0, 0], sizes = [8, 32], strides = [1, 1]} : vector<8x128xf32> to vector<8x32xf32>
    %c0_15 = arith.constant 0 : index
    %c0_16 = arith.constant 0 : index
    %38 = vector.load %arg18[%c0_15, %c0_16] : memref<16x128xf32, #tpu.memory_space<vmem>>, vector<16x32xf32>
    %c0_17 = arith.constant 0 : index
    %c0_18 = arith.constant 0 : index
    %39 = vector.load %arg19[%c0_17, %c0_18] : memref<16x128xf32, #tpu.memory_space<vmem>>, vector<16x32xf32>
    %cst_19 = arith.constant dense<0.000000e+00> : vector<8x16xf32>
    %40 = tpu.matmul %37, %38, %cst_19 {dimension_numbers = #tpu.dot_dimension_numbers<[1], [1], [0], [0], [0, 0, 1, 0], [], []>} : vector<8x32xf32>, vector<16x32xf32>, vector<8x16xf32> -> vector<8x16xf32>
    %cst_20 = arith.constant dense<0xFF800000> : vector<8xf32>
    %41 = vector.multi_reduction <maximumf>, %40, %cst_20 [1] : vector<8x16xf32> to vector<8xf32>
    %42 = vector.shape_cast %41 : vector<8xf32> to vector<8x1xf32>
    %43 = vector.broadcast %42 : vector<8x1xf32> to vector<8x16xf32>
    %44 = arith.subf %40, %43 : vector<8x16xf32>
    %45 = math.exp %44 : vector<8x16xf32>
    %cst_21 = arith.constant dense<0.000000e+00> : vector<8xf32>
    %46 = vector.multi_reduction <add>, %45, %cst_21 [1] : vector<8x16xf32> to vector<8xf32>
    %47 = vector.shape_cast %46 : vector<8xf32> to vector<8x1xf32>
    %cst_22 = arith.constant dense<0.000000e+00> : vector<8x32xf32>
    %48 = tpu.matmul %45, %39, %cst_22 {dimension_numbers = #tpu.dot_dimension_numbers<[1], [0], [0], [1], [0, 0, 1, 1], [], []>} : vector<8x16xf32>, vector<16x32xf32>, vector<8x32xf32> -> vector<8x32xf32>
    %49 = vector.broadcast %47 : vector<8x1xf32> to vector<8x32xf32>
    %50 = arith.divf %48, %49 : vector<8x32xf32>
    %c0_23 = arith.constant 0 : index
    %c0_24 = arith.constant 0 : index
    %51 = vector.load %arg20[%c0_23, %c0_24] : memref<8x128xf32, #tpu.memory_space<vmem>>, vector<8x32xf32>
    tpu.vector_store %arg20[%c0_23, %c0_24], %50 {strides = array<i32>} : memref<8x128xf32, #tpu.memory_space<vmem>>, vector<8x32xf32>,
    %52 = vector.extract_strided_slice %36 {offsets = [0, 32], sizes = [8, 32], strides = [1, 1]} : vector<8x128xf32> to vector<8x32xf32>
    %c0_25 = arith.constant 0 : index
    %c32 = arith.constant 32 : index
    %53 = vector.load %arg18[%c0_25, %c32] : memref<16x128xf32, #tpu.memory_space<vmem>>, vector<16x32xf32>
    %c0_26 = arith.constant 0 : index
    %c32_27 = arith.constant 32 : index
    %54 = vector.load %arg19[%c0_26, %c32_27] : memref<16x128xf32, #tpu.memory_space<vmem>>, vector<16x32xf32>
    %cst_28 = arith.constant dense<0.000000e+00> : vector<8x16xf32>
    %55 = tpu.matmul %52, %53, %cst_28 {dimension_numbers = #tpu.dot_dimension_numbers<[1], [1], [0], [0], [0, 0, 1, 0], [], []>} : vector<8x32xf32>, vector<16x32xf32>, vector<8x16xf32> -> vector<8x16xf32>
    %cst_29 = arith.constant dense<0xFF800000> : vector<8xf32>
    %56 = vector.multi_reduction <maximumf>, %55, %cst_29 [1] : vector<8x16xf32> to vector<8xf32>
    %57 = vector.shape_cast %56 : vector<8xf32> to vector<8x1xf32>
    %58 = vector.broadcast %57 : vector<8x1xf32> to vector<8x16xf32>
    %59 = arith.subf %55, %58 : vector<8x16xf32>
    %60 = math.exp %59 : vector<8x16xf32>
    %cst_30 = arith.constant dense<0.000000e+00> : vector<8xf32>
    %61 = vector.multi_reduction <add>, %60, %cst_30 [1] : vector<8x16xf32> to vector<8xf32>
    %62 = vector.shape_cast %61 : vector<8xf32> to vector<8x1xf32>
    %cst_31 = arith.constant dense<0.000000e+00> : vector<8x32xf32>
    %63 = tpu.matmul %60, %54, %cst_31 {dimension_numbers = #tpu.dot_dimension_numbers<[1], [0], [0], [1], [0, 0, 1, 1], [], []>} : vector<8x16xf32>, vector<16x32xf32>, vector<8x32xf32> -> vector<8x32xf32>
    %64 = vector.broadcast %62 : vector<8x1xf32> to vector<8x32xf32>
    %65 = arith.divf %63, %64 : vector<8x32xf32>
    %c0_32 = arith.constant 0 : index
    %c32_33 = arith.constant 32 : index
    %66 = vector.load %arg20[%c0_32, %c32_33] : memref<8x128xf32, #tpu.memory_space<vmem>>, vector<8x32xf32>
    tpu.vector_store %arg20[%c0_32, %c32_33], %65 {strides = array<i32>} : memref<8x128xf32, #tpu.memory_space<vmem>>, vector<8x32xf32>,
    %67 = vector.extract_strided_slice %36 {offsets = [0, 64], sizes = [8, 32], strides = [1, 1]} : vector<8x128xf32> to vector<8x32xf32>
    %c0_34 = arith.constant 0 : index
    %c64 = arith.constant 64 : index
    %68 = vector.load %arg18[%c0_34, %c64] : memref<16x128xf32, #tpu.memory_space<vmem>>, vector<16x32xf32>
    %c0_35 = arith.constant 0 : index
    %c64_36 = arith.constant 64 : index
    %69 = vector.load %arg19[%c0_35, %c64_36] : memref<16x128xf32, #tpu.memory_space<vmem>>, vector<16x32xf32>
    %cst_37 = arith.constant dense<0.000000e+00> : vector<8x16xf32>
    %70 = tpu.matmul %67, %68, %cst_37 {dimension_numbers = #tpu.dot_dimension_numbers<[1], [1], [0], [0], [0, 0, 1, 0], [], []>} : vector<8x32xf32>, vector<16x32xf32>, vector<8x16xf32> -> vector<8x16xf32>
    %cst_38 = arith.constant dense<0xFF800000> : vector<8xf32>
    %71 = vector.multi_reduction <maximumf>, %70, %cst_38 [1] : vector<8x16xf32> to vector<8xf32>
    %72 = vector.shape_cast %71 : vector<8xf32> to vector<8x1xf32>
    %73 = vector.broadcast %72 : vector<8x1xf32> to vector<8x16xf32>
    %74 = arith.subf %70, %73 : vector<8x16xf32>
    %75 = math.exp %74 : vector<8x16xf32>
    %cst_39 = arith.constant dense<0.000000e+00> : vector<8xf32>
    %76 = vector.multi_reduction <add>, %75, %cst_39 [1] : vector<8x16xf32> to vector<8xf32>
    %77 = vector.shape_cast %76 : vector<8xf32> to vector<8x1xf32>
    %cst_40 = arith.constant dense<0.000000e+00> : vector<8x32xf32>
    %78 = tpu.matmul %75, %69, %cst_40 {dimension_numbers = #tpu.dot_dimension_numbers<[1], [0], [0], [1], [0, 0, 1, 1], [], []>} : vector<8x16xf32>, vector<16x32xf32>, vector<8x32xf32> -> vector<8x32xf32>
    %79 = vector.broadcast %77 : vector<8x1xf32> to vector<8x32xf32>
    %80 = arith.divf %78, %79 : vector<8x32xf32>
    %c0_41 = arith.constant 0 : index
    %c64_42 = arith.constant 64 : index
    %81 = vector.load %arg20[%c0_41, %c64_42] : memref<8x128xf32, #tpu.memory_space<vmem>>, vector<8x32xf32>
    tpu.vector_store %arg20[%c0_41, %c64_42], %80 {strides = array<i32>} : memref<8x128xf32, #tpu.memory_space<vmem>>, vector<8x32xf32>,
    %82 = vector.extract_strided_slice %36 {offsets = [0, 96], sizes = [8, 32], strides = [1, 1]} : vector<8x128xf32> to vector<8x32xf32>
    %c0_43 = arith.constant 0 : index
    %c96 = arith.constant 96 : index
    %83 = vector.load %arg18[%c0_43, %c96] : memref<16x128xf32, #tpu.memory_space<vmem>>, vector<16x32xf32>
    %c0_44 = arith.constant 0 : index
    %c96_45 = arith.constant 96 : index
    %84 = vector.load %arg19[%c0_44, %c96_45] : memref<16x128xf32, #tpu.memory_space<vmem>>, vector<16x32xf32>
    %cst_46 = arith.constant dense<0.000000e+00> : vector<8x16xf32>
    %85 = tpu.matmul %82, %83, %cst_46 {dimension_numbers = #tpu.dot_dimension_numbers<[1], [1], [0], [0], [0, 0, 1, 0], [], []>} : vector<8x32xf32>, vector<16x32xf32>, vector<8x16xf32> -> vector<8x16xf32>
    %cst_47 = arith.constant dense<0xFF800000> : vector<8xf32>
    %86 = vector.multi_reduction <maximumf>, %85, %cst_47 [1] : vector<8x16xf32> to vector<8xf32>
    %87 = vector.shape_cast %86 : vector<8xf32> to vector<8x1xf32>
    %88 = vector.broadcast %87 : vector<8x1xf32> to vector<8x16xf32>
    %89 = arith.subf %85, %88 : vector<8x16xf32>
    %90 = math.exp %89 : vector<8x16xf32>
    %cst_48 = arith.constant dense<0.000000e+00> : vector<8xf32>
    %91 = vector.multi_reduction <add>, %90, %cst_48 [1] : vector<8x16xf32> to vector<8xf32>
    %92 = vector.shape_cast %91 : vector<8xf32> to vector<8x1xf32>
    %cst_49 = arith.constant dense<0.000000e+00> : vector<8x32xf32>
    %93 = tpu.matmul %90, %84, %cst_49 {dimension_numbers = #tpu.dot_dimension_numbers<[1], [0], [0], [1], [0, 0, 1, 1], [], []>} : vector<8x16xf32>, vector<16x32xf32>, vector<8x32xf32> -> vector<8x32xf32>
    %94 = vector.broadcast %92 : vector<8x1xf32> to vector<8x32xf32>
    %95 = arith.divf %93, %94 : vector<8x32xf32>
    %c0_50 = arith.constant 0 : index
    %c96_51 = arith.constant 96 : index
    %96 = vector.load %arg20[%c0_50, %c96_51] : memref<8x128xf32, #tpu.memory_space<vmem>>, vector<8x32xf32>
    tpu.vector_store %arg20[%c0_50, %c96_51], %95 {strides = array<i32>} : memref<8x128xf32, #tpu.memory_space<vmem>>, vector<8x32xf32>,
    %c0_52 = arith.constant 0 : index
    %c0_53 = arith.constant 0 : index
    %97 = vector.load %arg20[%c0_52, %c0_53] : memref<8x128xf32, #tpu.memory_space<vmem>>, vector<8x128xf32>
    %c0_54 = arith.constant 0 : index
    %c0_55 = arith.constant 0 : index
    %98 = vector.load %arg9[%c0_54, %c0_55] : memref<128x128xf32, #tpu.memory_space<vmem>>, vector<128x128xf32>
    %cst_56 = arith.constant dense<0.000000e+00> : vector<8x128xf32>
    %99 = tpu.matmul %97, %98, %cst_56 {dimension_numbers = #tpu.dot_dimension_numbers<[1], [0], [0], [1], [0, 0, 1, 1], [], []>} : vector<8x128xf32>, vector<128x128xf32>, vector<8x128xf32> -> vector<8x128xf32>
    %c0_57 = arith.constant 0 : index
    %c0_58 = arith.constant 0 : index
    %100 = vector.load %arg10[%c0_57, %c0_58] : memref<1x128xf32, #tpu.memory_space<vmem>>, vector<1x128xf32>
    %101 = vector.broadcast %100 : vector<1x128xf32> to vector<8x128xf32>
    %102 = arith.addf %99, %101 : vector<8x128xf32>
    %103 = arith.addf %7, %102 : vector<8x128xf32>
    %cst_59 = arith.constant dense<0.000000e+00> : vector<8xf32>
    %104 = vector.multi_reduction <add>, %103, %cst_59 [1] : vector<8x128xf32> to vector<8xf32>
    %105 = vector.shape_cast %104 : vector<8xf32> to vector<8x1xf32>
    %cst_60 = arith.constant 1.280000e+02 : f32
    %106 = vector.broadcast %cst_60 : f32 to vector<8x1xf32>
    %107 = arith.divf %105, %106 : vector<8x1xf32>
    %108 = vector.broadcast %107 : vector<8x1xf32> to vector<8x128xf32>
    %109 = arith.subf %103, %108 : vector<8x128xf32>
    %110 = arith.mulf %109, %109 : vector<8x128xf32>
    %cst_61 = arith.constant dense<0.000000e+00> : vector<8xf32>
    %111 = vector.multi_reduction <add>, %110, %cst_61 [1] : vector<8x128xf32> to vector<8xf32>
    %112 = vector.shape_cast %111 : vector<8xf32> to vector<8x1xf32>
    %cst_62 = arith.constant 1.280000e+02 : f32
    %113 = vector.broadcast %cst_62 : f32 to vector<8x1xf32>
    %114 = arith.divf %112, %113 : vector<8x1xf32>
    %115 = vector.broadcast %107 : vector<8x1xf32> to vector<8x128xf32>
    %116 = arith.subf %103, %115 : vector<8x128xf32>
    %cst_63 = arith.constant 9.99999974E-6 : f32
    %117 = vector.broadcast %cst_63 : f32 to vector<8x1xf32>
    %118 = arith.addf %114, %117 : vector<8x1xf32>
    %119 = math.rsqrt %118 : vector<8x1xf32>
    %120 = vector.broadcast %119 : vector<8x1xf32> to vector<8x128xf32>
    %121 = arith.mulf %116, %120 : vector<8x128xf32>
    %c0_64 = arith.constant 0 : index
    %c0_65 = arith.constant 0 : index
    %122 = vector.load %arg11[%c0_64, %c0_65] : memref<1x128xf32, #tpu.memory_space<vmem>>, vector<1x128xf32>
    %123 = vector.broadcast %122 : vector<1x128xf32> to vector<8x128xf32>
    %124 = arith.mulf %121, %123 : vector<8x128xf32>
    %c0_66 = arith.constant 0 : index
    %c0_67 = arith.constant 0 : index
    %125 = vector.load %arg12[%c0_66, %c0_67] : memref<1x128xf32, #tpu.memory_space<vmem>>, vector<1x128xf32>
    %126 = vector.broadcast %125 : vector<1x128xf32> to vector<8x128xf32>
    %127 = arith.addf %124, %126 : vector<8x128xf32>
    %c0_68 = arith.constant 0 : index
    %c0_69 = arith.constant 0 : index
    %128 = vector.load %arg13[%c0_68, %c0_69] : memref<128x512xf32, #tpu.memory_space<vmem>>, vector<128x512xf32>
    %cst_70 = arith.constant dense<0.000000e+00> : vector<8x512xf32>
    %129 = tpu.matmul %127, %128, %cst_70 {dimension_numbers = #tpu.dot_dimension_numbers<[1], [0], [0], [1], [0, 0, 1, 1], [], []>} : vector<8x128xf32>, vector<128x512xf32>, vector<8x512xf32> -> vector<8x512xf32>
    %c0_71 = arith.constant 0 : index
    %c0_72 = arith.constant 0 : index
    %130 = vector.load %arg14[%c0_71, %c0_72] : memref<1x512xf32, #tpu.memory_space<vmem>>, vector<1x512xf32>
    %131 = vector.broadcast %130 : vector<1x512xf32> to vector<8x512xf32>
    %132 = arith.addf %129, %131 : vector<8x512xf32>
    %cst_73 = arith.constant 5.000000e-01 : f32
    %133 = vector.broadcast %cst_73 : f32 to vector<8x512xf32>
    %134 = arith.mulf %133, %132 : vector<8x512xf32>
    %cst_74 = arith.constant 2.000000e+00 : f32
    %135 = math.sqrt %cst_74 : f32
    %cst_75 = arith.constant 1.000000e+00 : f32
    %136 = arith.divf %cst_75, %135 : f32
    %137 = vector.broadcast %136 : f32 to vector<8x512xf32>
    %138 = arith.mulf %132, %137 : vector<8x512xf32>
    %139 = math.erf %138 : vector<8x512xf32>
    %cst_76 = arith.constant 1.000000e+00 : f32
    %140 = vector.broadcast %cst_76 : f32 to vector<8x512xf32>
    %141 = arith.addf %140, %139 : vector<8x512xf32>
    %142 = arith.mulf %134, %141 : vector<8x512xf32>
    %c0_77 = arith.constant 0 : index
    %c0_78 = arith.constant 0 : index
    %143 = vector.load %arg15[%c0_77, %c0_78] : memref<512x128xf32, #tpu.memory_space<vmem>>, vector<512x128xf32>
    %cst_79 = arith.constant dense<0.000000e+00> : vector<8x128xf32>
    %144 = tpu.matmul %142, %143, %cst_79 {dimension_numbers = #tpu.dot_dimension_numbers<[1], [0], [0], [1], [0, 0, 1, 1], [], []>} : vector<8x512xf32>, vector<512x128xf32>, vector<8x128xf32> -> vector<8x128xf32>
    %c0_80 = arith.constant 0 : index
    %c0_81 = arith.constant 0 : index
    %145 = vector.load %arg16[%c0_80, %c0_81] : memref<1x128xf32, #tpu.memory_space<vmem>>, vector<1x128xf32>
    %146 = vector.broadcast %145 : vector<1x128xf32> to vector<8x128xf32>
    %147 = arith.addf %144, %146 : vector<8x128xf32>
    %148 = arith.addf %103, %147 : vector<8x128xf32>
    %c0_82 = arith.constant 0 : index
    %c0_83 = arith.constant 0 : index
    %c0_84 = arith.constant 0 : index
    %149 = vector.load %arg17[%c0_82, %c0_83, %c0_84] : memref<1x8x128xf32, #tpu.memory_space<vmem>>, vector<1x8x128xf32>
    %150 = vector.shape_cast %149 : vector<1x8x128xf32> to vector<8x128xf32>
    %151 = vector.shape_cast %148 : vector<8x128xf32> to vector<1x8x128xf32>
    tpu.vector_store %arg17[%c0_82, %c0_83, %c0_84], %151 {strides = array<i32>} : memref<1x8x128xf32, #tpu.memory_space<vmem>>, vector<1x8x128xf32>,
    return
  }
  func.func @transform_0(%arg0: i32, %arg1: i32) -> (i32, i32, i32) {
    %c0_i32 = arith.constant 0 : i32
    %c0_i32_0 = arith.constant 0 : i32
    %c0_i32_1 = arith.constant 0 : i32
    return %arg0, %c0_i32, %c0_i32_0 : i32, i32, i32
  }
  func.func @transform_1(%arg0: i32, %arg1: i32) -> (i32, i32) {
    %c0_i32 = arith.constant 0 : i32
    %c0_i32_0 = arith.constant 0 : i32
    %c0_i32_1 = arith.constant 0 : i32
    return %c0_i32, %c0_i32_0 : i32, i32
  }
  func.func @transform_2(%arg0: i32, %arg1: i32) -> (i32, i32) {
    %c0_i32 = arith.constant 0 : i32
    %c0_i32_0 = arith.constant 0 : i32
    %c0_i32_1 = arith.constant 0 : i32
    return %c0_i32, %c0_i32_0 : i32, i32
  }
  func.func @transform_3(%arg0: i32, %arg1: i32) -> (i32, i32) {
    %c0_i32 = arith.constant 0 : i32
    %c0_i32_0 = arith.constant 0 : i32
    %c0_i32_1 = arith.constant 0 : i32
    return %c0_i32, %c0_i32_0 : i32, i32
  }
  func.func @transform_4(%arg0: i32, %arg1: i32) -> (i32, i32) {
    %c0_i32 = arith.constant 0 : i32
    %c0_i32_0 = arith.constant 0 : i32
    %c0_i32_1 = arith.constant 0 : i32
    return %c0_i32, %c0_i32_0 : i32, i32
  }
  func.func @transform_5(%arg0: i32, %arg1: i32) -> (i32, i32) {
    %c0_i32 = arith.constant 0 : i32
    %c0_i32_0 = arith.constant 0 : i32
    %c0_i32_1 = arith.constant 0 : i32
    return %c0_i32, %c0_i32_0 : i32, i32
  }
  func.func @transform_6(%arg0: i32, %arg1: i32) -> (i32, i32) {
    %c0_i32 = arith.constant 0 : i32
    %c0_i32_0 = arith.constant 0 : i32
    %c0_i32_1 = arith.constant 0 : i32
    return %c0_i32, %c0_i32_0 : i32, i32
  }
  func.func @transform_7(%arg0: i32, %arg1: i32) -> (i32, i32) {
    %c0_i32 = arith.constant 0 : i32
    %c0_i32_0 = arith.constant 0 : i32
    %c0_i32_1 = arith.constant 0 : i32
    return %c0_i32, %c0_i32_0 : i32, i32
  }
  func.func @transform_8(%arg0: i32, %arg1: i32) -> (i32, i32) {
    %c0_i32 = arith.constant 0 : i32
    %c0_i32_0 = arith.constant 0 : i32
    %c0_i32_1 = arith.constant 0 : i32
    return %c0_i32, %c0_i32_0 : i32, i32
  }
  func.func @transform_9(%arg0: i32, %arg1: i32) -> (i32, i32) {
    %c0_i32 = arith.constant 0 : i32
    %c0_i32_0 = arith.constant 0 : i32
    %c0_i32_1 = arith.constant 0 : i32
    return %c0_i32, %c0_i32_0 : i32, i32
  }
  func.func @transform_10(%arg0: i32, %arg1: i32) -> (i32, i32) {
    %c0_i32 = arith.constant 0 : i32
    %c0_i32_0 = arith.constant 0 : i32
    %c0_i32_1 = arith.constant 0 : i32
    return %c0_i32, %c0_i32_0 : i32, i32
  }
  func.func @transform_11(%arg0: i32, %arg1: i32) -> (i32, i32) {
    %c0_i32 = arith.constant 0 : i32
    %c0_i32_0 = arith.constant 0 : i32
    %c0_i32_1 = arith.constant 0 : i32
    return %c0_i32, %c0_i32_0 : i32, i32
  }
  func.func @transform_12(%arg0: i32, %arg1: i32) -> (i32, i32) {
    %c0_i32 = arith.constant 0 : i32
    %c0_i32_0 = arith.constant 0 : i32
    %c0_i32_1 = arith.constant 0 : i32
    return %c0_i32, %c0_i32_0 : i32, i32
  }
  func.func @transform_13(%arg0: i32, %arg1: i32) -> (i32, i32) {
    %c0_i32 = arith.constant 0 : i32
    %c0_i32_0 = arith.constant 0 : i32
    %c0_i32_1 = arith.constant 0 : i32
    return %c0_i32, %c0_i32_0 : i32, i32
  }
  func.func @transform_14(%arg0: i32, %arg1: i32) -> (i32, i32) {
    %c0_i32 = arith.constant 0 : i32
    %c0_i32_0 = arith.constant 0 : i32
    %c0_i32_1 = arith.constant 0 : i32
    return %c0_i32, %c0_i32_0 : i32, i32
  }
  func.func @transform_15(%arg0: i32, %arg1: i32) -> (i32, i32, i32) {
    %c0_i32 = arith.constant 0 : i32
    %c0_i32_0 = arith.constant 0 : i32
    return %arg0, %arg1, %c0_i32 : i32, i32, i32
  }
}

</mosaic_0001>

<bundles_post_ra>
// kernel: tpu_custom_call.1
= control target key start
LH: loop header
LB: loop body
LE: loop exit
PB: predicated region body
PF: predicated region fallthrough
CT: control target
= control target key end

     0   :  { %s4136_s0 = inlined_call_operand.hbm [shape: f32[2,16,128], index: 0, kind: input, shape index: {}]   ;;  %s4137_s1 = inlined_call_operand.vmem [shape: f32[1,128], index: 1, kind: input, shape index: {}]   ;;  %s4138_s2 = inlined_call_operand.hbm [shape: f32[1,128], index: 2, kind: input, shape index: {}]   ;;  %s4139_s3 = inlined_call_operand.hbm [shape: f32[128,128], index: 3, kind: input, shape index: {}]   ;;  %s4140_s4 = inlined_call_operand.vmem [shape: f32[1,128], index: 4, kind: input, shape index: {}]   ;;  %s4141_s5 = inlined_call_operand.hbm [shape: f32[128,256], index: 5, kind: input, shape index: {}]   ;;  %s4142_s6 = inlined_call_operand.vmem [shape: f32[1,256], index: 6, kind: input, shape index: {}]   ;;  %s4143_s7 = inlined_call_operand.hbm [shape: f32[128,128], index: 7, kind: input, shape index: {}]   ;;  %s4144_s8 = inlined_call_operand.vmem [shape: f32[1,128], index: 8, kind: input, shape index: {}]   ;;  %s4145_s9 = inlined_call_operand.vmem [shape: f32[1,128], index: 9, kind: input, shape index: {}]   ;;  %s4146_s10 = inlined_call_operand.vmem [shape: f32[1,128], index: 10, kind: input, shape index: {}]   ;;  %s4147_s11 = inlined_call_operand.hbm [shape: f32[128,512], index: 11, kind: input, shape index: {}]   ;;  %s4148_s12 = inlined_call_operand.vmem [shape: f32[1,512], index: 12, kind: input, shape index: {}]   ;;  %s4149_s13 = inlined_call_operand.hbm [shape: f32[512,128], index: 13, kind: input, shape index: {}]   ;;  %s4150_s14 = inlined_call_operand.vmem [shape: f32[1,128], index: 14, kind: input, shape index: {}]   ;;  %s4151_s15 = inlined_call_operand.hbm [shape: f32[2,16,128], index: 15, kind: output, shape index: {}]  }
   0x1   :  { %4177 = sst [smem:[#allocation35_spill]] %s4138_s2 }
   0x2   :  { %4178 = sst [smem:[#allocation36_spill]] %s4140_s4 }
   0x3   :  { %4179 = sst [smem:[#allocation37_spill]] %s4144_s8 }
   0x4   :  { %4180 = sst [smem:[#allocation38_spill]] %s4145_s9 }
   0x5   :  { %4181 = sst [smem:[#allocation39_spill]] %s4146_s10 }
   0x6   :  { %4182 = sst [smem:[#allocation40_spill]] %s4148_s12 }
   0x7   :  { %4183 = sst [smem:[#allocation41_spill]] %s4150_s14 }
   0x8   :  { %4184 = sst [smem:[#allocation42_spill]] %s4151_s15 }
   0x9   :  { %20 = vsyncpa [#allocation6], 0 }
   0xa   :  { %21 = vsyncpa [#allocation9], 0 }
   0xb   :  { %22 = vsyncpa [#allocation12], 0 }
   0xc   :  { %23 = vsyncpa [#allocation15], 0 }
   0xd   :  { %24 = vsyncpa [#allocation7], 0 }
   0xe   :  { %26 = vsyncpa [#allocation7 + $0x1], 0  ;;  %s3579_s18 = smov 0   ;;  %s3581_s19 = smov 0  }
   0xf   :  { %s3583_s20 = smov 0   ;;  %s3585_s21 = smov 0  }
  0x10   :  { %s3587_s22 = smov 0   ;;  %s3589_s23 = smov 0  }
  0x11   :  { %s3591_s24 = smov 0   ;;  %s3593_s25 = smov 0  }
  0x12   :  { %s3595_s26 = smov 0   ;;  %s3597_s27 = smov 0  }
  0x13   :  { %s3599_s28 = smov 0  }
  0x14 LB: > { %4185 = sst [smem:[#allocation23_spill]] %s3432_s18  ;;  %s2350_s29 = sadd.s32 4294967295, %s3472_s28   ;;  %s3472_s28 = sphi %s3599_s28, %s32_s28   ;;  %s3468_s27 = sphi %s3597_s27, %s4237_s27   ;;  %s3464_s26 = sphi %s3595_s26, %s4236_s26   ;;  %s3460_s25 = sphi %s3593_s25, %s4235_s25   ;;  %s3456_s24 = sphi %s3591_s24, %s4234_s24   ;;  %s3452_s23 = sphi %s3589_s23, %s4243_s23   ;;  %s3448_s22 = sphi %s3587_s22, %s4242_s22   ;;  %s3444_s21 = sphi %s3585_s21, %s4241_s21   ;;  %s3440_s20 = sphi %s3583_s20, %s4240_s20   ;;  %s3436_s19 = sphi %s3581_s19, %s4239_s19   ;;  %s3432_s18 = sphi %s3579_s18, %s4238_s18  }
  0x15   : > { %4186 = sst [smem:[#allocation24_spill]] %s3440_s20  ;;  %s2351_s30 = sadd.s32 4294967294, %s3472_s28  }
  0x16   : > { %4187 = sst [smem:[#allocation25_spill]] %s3452_s23  ;;  %s41_s16 = sadd.s32 1, %s3464_s26 }
  0x17   : > { %4188 = sst [smem:[#allocation26_spill]] %s3464_s26  ;;  %s44_s17 = sadd.s32 1, %s3468_s27 }
  0x18   : > { %4189 = sst [smem:[#allocation27_spill]] %s3468_s27  ;;  %p42_p0 = scmp.ge.s32.totalorder %s41_s16, 2 }
  0x19   : > { %4190 = sst [smem:[#allocation28_spill]] %s3472_s28  ;;  %s51_s15 = sadd.s32 1, %s3452_s23 }
  0x1a   : > { %p3639_p1 = scmp.eq.s32.totalorder %s2350_s29, 0  ;;  %s373_s12 = sadd.s32 1, %s3440_s20 }
  0x1b   : > { %s4245_s16 = smov (%p42_p0, %s41_s16), 0  ;;  %s4247_s17 = smov (!%p42_p0, %s44_s17), %s3468_s27 }
  0x1c   : > { %s4191_s14 = scalar_select %p3639_p1, 1, 0 }
  0x1d   : > { %4192 = sst [smem:[#allocation29_spill]] %s4245_s16  ;;  %s369_s10 = ssub.s32 %s3464_s26, %s4245_s16 }
  0x1e   : > { %p383_p2 = scmp.ne.s32.totalorder %s3440_s20, %s3436_s19  ;;  %p46_p3 = scmp.ge.s32.totalorder %s4247_s17, 2 }
  0x1f   : > { %p384_p4 = scmp.eq.s32.totalorder %s2350_s29, 3  ;;  %p389_p5 = scmp.ne.s32.totalorder %s3436_s19, %s3432_s18 }
  0x20   : > { %p390_p6 = scmp.eq.s32.totalorder %s2351_s30, 3  ;;  %s4249_s17 = smov (%p46_p3, %s4247_s17), 0 }
  0x21   : > { %4193 = sst [smem:[#allocation30_spill]] %s4249_s17  ;;  %p3655_p7 = por %p384_p4, %p383_p2 }
  0x22   : > { %p3659_p8 = por %p390_p6, %p389_p5  ;;  %s48_s4 = ssub.s32 %s3468_s27, %s4249_s17 }
  0x23   : > { %s4194_s9 = scalar_select %p3655_p7, 1, 0 }
  0x24   : > { %s4196_s8 = scalar_select %p3659_p8, 1, 0 }
  0x25   : > { %4195 = sst [smem:[#allocation31_spill]] %s4194_s9  ;;  %p2352_p9 = scmp.ge.s32.totalorder %s3472_s28, 1 }
  0x26   : > { %4197 = sst [smem:[#allocation32_spill]] %s4196_s8  ;;  %p49_p10 = scmp.eq.s32.totalorder %s48_s4, 0 }
  0x27   : > { %s370_s16 = sor.u32 %s369_s10, %s48_s4  ;;  %p397_p12 = scmp.lt.s32.totalorder %s3472_s28, 5 }
  0x28   : > { %p371_p11 = scmp.eq.s32.totalorder %s370_s16, 0  ;;  %s3478_s8 = smov [#allocation8]  }
  0x29   : > { %s3668_s29 = scalar_select %p49_p10, %s3452_s23, %s51_s15  }
  0x2a   : > { %s3671_s30 = scalar_select %p371_p11, %s3440_s20, %s373_s12  }
  0x2b   : > { %4198 = sst [smem:[#allocation33_spill]] %s3668_s29  ;;  %p3673_p13 = pnand %p2352_p9, %p397_p12 }
  0x2c   : > { %4199 = sst [smem:[#allocation34_spill]] %s3671_s30  ;;  %s429_s18 = sshll.u32 %s3478_s8, 4  ;;  %s430_s18 = int_to_ptr.vmem [resolvable:$true] %s429_s18 }
  0x2d   : > { %s4200_s26 = scalar_select %p3673_p13, 1, 0 }
  0x2e   : > { %p4160_p0 = pneg %p3673_p13  ;;  %s3479_s17 = smov [#allocation11]  }
  0x2f   : > { %s455_s27 = sshll.u32 %s3479_s17, 4  ;;  %s4202_s2 = sld [smem:[#allocation35_spill]]  ;;  %s3688_s27 = int_to_ptr.vmem [resolvable:$true] %s455_s27 }
  0x30   : > { %p3684_p2 = pnand %p4160_p0, %p3639_p1 }
  0x32   : > { %s4201_s4 = scalar_select %p3684_p2, 1, 0 }
  0x33   : > { %p3698_p4 = pneg %p3684_p2 }
  0x35   : > { %s3136_s15 = scalar_lea.hbm %s4202_s2, 16 }
  0x36   : > { %p3137_p3 = scmp.ne.s32.totalorder %s4202_s2, %s3136_s15  ;;  %p3143_p9 = scmp.lt.u32.totalorder %s3136_s15, %s4202_s2 }
  0x37   : > { %s4203_s8 = scalar_select %p3698_p4, 1, 0 }
  0x38   : > { %p3139_p5 = pnand %p3698_p4, %p3137_p3 }
  0x3a   : > { %p3140_p6 = pneg %p3139_p5 }
  0x3c   : > { %p3145_p10 = pnand %p3143_p9, %p3140_p6 }
  0x3e   : > { %3148 = shalt.err (!%p3145_p10)
}
  0x3f   : > { %s3149_s10 = scalar_lea.vmem %s430_s18, 16  ;;  %s3156_s29 = scalar_lea.vmem %s430_s18, 32 }
  0x40   : > { %p3150_p11 = scmp.ne.s32.totalorder %s430_s18, %s3149_s10  ;;  %p3157_p8 = scmp.lt.s32.totalorder %s430_s18, %s430_s18 }
  0x41   : > { %p3158_p7 = scmp.lt.s32.totalorder %s3156_s29, %s3149_s10 }
  0x42   : > { %p3152_p12 = pnand %p3150_p11, %p3698_p4 }
  0x43   : > { %p3159_p13 = por %p3158_p7, %p3157_p8 }
  0x44   : > { %p3153_p0 = pneg %p3152_p12 }
  0x46   : > { %p3160_p1 = pnand %p3159_p13, %p3153_p0 }
  0x48   : > { %3163 = shalt.err (!%p3160_p1)
}
  0x49   : > { %2927 = dma.hbm_to_vmem [thread:$0]  (!%p3684_p2), %s4202_s2, 16, %s430_s18, [#allocation9]  }
  0x4a   : > { %s3164_s17 = scalar_lea.hbm %s4141_s5, 4096 }
  0x4b   : > { %p3165_p3 = scmp.ne.s32.totalorder %s4141_s5, %s3164_s17  ;;  %p3171_p1 = scmp.lt.u32.totalorder %s3164_s17, %s4141_s5 }
  0x4d   : > { %p3167_p5 = pnand %p3165_p3, %p3698_p4 }
  0x4f   : > { %p3168_p7 = pneg %p3167_p5 }
  0x51   : > { %p3173_p8 = pnand %p3171_p1, %p3168_p7 }
  0x53   : > { %3176 = shalt.err (!%p3173_p8)
}
  0x54   : > { %s3177_s18 = scalar_lea.vmem %s3688_s27, 4096  ;;  %p3185_p9 = scmp.lt.s32.totalorder %s3688_s27, %s3688_s27 }
  0x55   : > { %p3178_p13 = scmp.ne.s32.totalorder %s3688_s27, %s3177_s18  ;;  %p3186_p10 = scmp.lt.s32.totalorder %s3177_s18, %s3177_s18 }
  0x57   : > { %p3180_p0 = pnand %p3178_p13, %p3698_p4  ;;  %p3187_p11 = por %p3186_p10, %p3185_p9 }
  0x59   : > { %p3181_p6 = pneg %p3180_p0 }
  0x5b   : > { %p3188_p12 = pnand %p3187_p11, %p3181_p6 }
  0x5d   : > { %3191 = shalt.err (!%p3188_p12)
}
  0x5e   : > { %s3480_s20 = smov 256   ;;  %s3481_s30 = smov 16  }
  0x5f   : > { %2933 = dma.hbm_to_vmem [thread:$0]  (!%p3684_p2), %s4141_s5, 4096, %s3688_s27, [#allocation12], %s3480_s20, %s3480_s20, %s3481_s30  }
  0x60   : > { %s3482_s23 = smov [#allocation14]   ;;  %s3192_s29 = scalar_lea.hbm %s4147_s11, 8192 }
  0x61   : > { %s493_s15 = sshll.u32 %s3482_s23, 4  ;;  %p3193_p3 = scmp.ne.s32.totalorder %s4147_s11, %s3192_s29  ;;  %s494_s15 = int_to_ptr.vmem [resolvable:$true] %s493_s15 }
  0x62   : > { %p3199_p1 = scmp.lt.u32.totalorder %s3192_s29, %s4147_s11 }
  0x63   : > { %p3195_p5 = pnand %p3193_p3, %p3698_p4 }
  0x65   : > { %p3196_p7 = pneg %p3195_p5 }
  0x67   : > { %p3201_p8 = pnand %p3199_p1, %p3196_p7 }
  0x69   : > { %3204 = shalt.err (!%p3201_p8)
}
  0x6a   : > { %s3205_s27 = scalar_lea.vmem %s494_s15, 8192  ;;  %p3213_p9 = scmp.lt.s32.totalorder %s494_s15, %s494_s15 }
  0x6b   : > { %p3206_p13 = scmp.ne.s32.totalorder %s494_s15, %s3205_s27  ;;  %p3214_p10 = scmp.lt.s32.totalorder %s3205_s27, %s3205_s27 }
  0x6d   : > { %p3208_p0 = pnand %p3206_p13, %p3698_p4  ;;  %p3215_p11 = por %p3214_p10, %p3213_p9 }
  0x6f   : > { %p3209_p6 = pneg %p3208_p0 }
  0x71   : > { %p3216_p12 = pnand %p3215_p11, %p3209_p6 }
  0x73   : > { %3219 = shalt.err (!%p3216_p12)
}
  0x74   : > { %s3483_s2 = smov 512   ;;  %s3484_s9 = smov 32  }
  0x75   : > { %2939 = dma.hbm_to_vmem [thread:$0]  (!%p3684_p2), %s4147_s11, 8192, %s494_s15, [#allocation15], %s3483_s2, %s3483_s2, %s3484_s9  }
  0x76   : > { %p64_p3 = scmp.ne.s32.totalorder %s3448_s22, %s3444_s21  ;;  %s2402_s30 = sshll.u32 %s3460_s25, 8 }
  0x77   : > { %s3761_s23 = scalar_lea.hbm %s4136_s0, %s2402_s30  ;;  %p4204_p5 = scmp.ne.s32.totalorder %s4191_s14, 0 }
  0x78   : > { %s3485_s10 = smov [#allocation5]   ;;  %p4206_p1 = scmp.ne.s32.totalorder %s4200_s26, 0 }
  0x79   : > { %p3765_p7 = por %p4204_p5, %p64_p3  ;;  %s412_s29 = sshll.u32 %s3485_s10, 4  ;;  %s3769_s29 = int_to_ptr.vmem [resolvable:$true] %s412_s29 }
  0x7a   : > { %p4207_p8 = pneg %p4206_p1  ;;  %s3486_s15 = smov [#allocation10]  }
  0x7b   : > { %s4205_s17 = scalar_select %p3765_p7, 1, 0 }
  0x7c   : > { %p3776_p13 = pnand %p4207_p8, %p3765_p7  ;;  %s3780_s18 = sshll.u32 %s3486_s15, 4  ;;  %s440_s18 = int_to_ptr.vmem [resolvable:$true] %s3780_s18 }
  0x7d   : > { %s3220_s27 = scalar_lea.hbm %s3761_s23, 256  ;;  %s3225_s28 = scalar_lea.hbm %s4136_s0, 512 }
  0x7e   : > { %p3221_p0 = scmp.ne.s32.totalorder %s3761_s23, %s3220_s27  ;;  %p3222_p6 = pneg %p3776_p13 }
  0x7f   : > { %p3226_p11 = scmp.lt.u32.totalorder %s3761_s23, %s4136_s0  ;;  %p3227_p12 = scmp.lt.u32.totalorder %s3225_s28, %s3220_s27 }
  0x80   : > { %p3223_p9 = pnand %p3222_p6, %p3221_p0  ;;  %p3229_p5 = scmp.lt.u32.totalorder %s3220_s27, %s3761_s23 }
  0x81   : > { %p3228_p3 = por %p3227_p12, %p3226_p11 }
  0x82   : > { %p3224_p10 = pneg %p3223_p9 }
  0x83   : > { %p3230_p8 = por %p3229_p5, %p3228_p3 }
  0x85   : > { %p3231_p7 = pnand %p3230_p8, %p3224_p10 }
  0x87   : > { %3234 = shalt.err (!%p3231_p7)
}
  0x88   : > { %s3235_s12 = scalar_lea.vmem %s3769_s29, 256  ;;  %p3243_p2 = scmp.lt.s32.totalorder %s3769_s29, %s3769_s29 }
  0x89   : > { %p3236_p0 = scmp.ne.s32.totalorder %s3769_s29, %s3235_s12  ;;  %p3244_p4 = scmp.lt.s32.totalorder %s3235_s12, %s3235_s12 }
  0x8b   : > { %p3238_p9 = pnand %p3236_p0, %p3222_p6  ;;  %p3245_p11 = por %p3244_p4, %p3243_p2 }
  0x8d   : > { %p3239_p1 = pneg %p3238_p9 }
  0x8f   : > { %p3246_p12 = pnand %p3245_p11, %p3239_p1 }
  0x91   : > { %3249 = shalt.err (!%p3246_p12)
}
  0x92   : > { %s3487_s16 = smov 128   ;;  %s3488_s10 = smov 8  }
  0x93   : > { %2924 = dma.hbm_to_vmem [thread:$0]  (!%p3776_p13), %s3761_s23, 256, %s3769_s29, [#allocation6], %s3487_s16, %s3487_s16, %s3488_s10  }
  0x94   : > { %s3489_s15 = smov [#allocation13]   ;;  %s3250_s28 = scalar_lea.hbm %s4139_s3, 2048 }
  0x95   : > { %s471_s27 = sshll.u32 %s3489_s15, 4  ;;  %p3251_p2 = scmp.ne.s32.totalorder %s4139_s3, %s3250_s28  ;;  %s472_s27 = int_to_ptr.vmem [resolvable:$true] %s471_s27 }
  0x96   : > { %p4209_p4 = scmp.ne.s32.totalorder %s4203_s8, 0  ;;  %p3257_p6 = scmp.lt.u32.totalorder %s3250_s28, %s4139_s3 }
  0x98   : > { %p3253_p7 = pnand %p3251_p2, %p4209_p4 }
  0x9a   : > { %p3254_p1 = pneg %p3253_p7 }
  0x9c   : > { %p3259_p10 = pnand %p3257_p6, %p3254_p1 }
  0x9e   : > { %3262 = shalt.err (!%p3259_p10)
}
  0x9f   : > { %s3263_s23 = scalar_lea.vmem %s440_s18, 2048  ;;  %p3271_p8 = scmp.lt.s32.totalorder %s440_s18, %s440_s18 }
  0xa0   : > { %p3264_p13 = scmp.ne.s32.totalorder %s440_s18, %s3263_s23  ;;  %p3272_p0 = scmp.lt.s32.totalorder %s3263_s23, %s3263_s23 }
  0xa2   : > { %p3266_p3 = pnand %p3264_p13, %p4209_p4  ;;  %p3273_p9 = por %p3272_p0, %p3271_p8 }
  0xa4   : > { %p3267_p5 = pneg %p3266_p3 }
  0xa6   : > { %p3274_p11 = pnand %p3273_p9, %p3267_p5 }
  0xa8   : > { %3277 = shalt.err (!%p3274_p11)
}
  0xa9   : > { %p4210_p12 = scmp.ne.s32.totalorder %s4201_s4, 0  ;;  %s3278_s28 = scalar_lea.hbm %s4143_s7, 2048 }
  0xaa   : > { %p3279_p2 = scmp.ne.s32.totalorder %s4143_s7, %s3278_s28  ;;  %p3285_p6 = scmp.lt.u32.totalorder %s3278_s28, %s4143_s7 }
  0xab   : > { %2930 = dma.hbm_to_vmem [thread:$0]  (!%p4210_p12), %s4139_s3, 2048, %s440_s18, [#allocation9], %s3487_s16, %s3487_s16, %s3488_s10  }
  0xac   : > { %p3281_p7 = pnand %p3279_p2, %p4209_p4 }
  0xae   : > { %p3282_p1 = pneg %p3281_p7 }
  0xb0   : > { %p3287_p10 = pnand %p3285_p6, %p3282_p1 }
  0xb2   : > { %3290 = shalt.err (!%p3287_p10)
}
  0xb3   : > { %s3291_s23 = scalar_lea.vmem %s472_s27, 2048  ;;  %p3299_p8 = scmp.lt.s32.totalorder %s472_s27, %s472_s27 }
  0xb4   : > { %p3292_p13 = scmp.ne.s32.totalorder %s472_s27, %s3291_s23  ;;  %p3300_p0 = scmp.lt.s32.totalorder %s3291_s23, %s3291_s23 }
  0xb6   : > { %p3294_p3 = pnand %p3292_p13, %p4209_p4  ;;  %p3301_p9 = por %p3300_p0, %p3299_p8 }
  0xb8   : > { %p3295_p5 = pneg %p3294_p3 }
  0xba   : > { %p3302_p11 = pnand %p3301_p9, %p3295_p5 }
  0xbc   : > { %3305 = shalt.err (!%p3302_p11)
}
  0xbd   : > { %2936 = dma.hbm_to_vmem [thread:$0]  (!%p4210_p12), %s4143_s7, 2048, %s472_s27, [#allocation12], %s3487_s16, %s3487_s16, %s3488_s10  }
  0xbe   : > { %s3490_s15 = smov [#allocation16]   ;;  %s3306_s20 = scalar_lea.hbm %s4149_s13, 8192 }
  0xbf   : > { %s509_s2 = sshll.u32 %s3490_s15, 4  ;;  %p3307_p2 = scmp.ne.s32.totalorder %s4149_s13, %s3306_s20  ;;  %s510_s2 = int_to_ptr.vmem [resolvable:$true] %s509_s2 }
  0xc0   : > { %p3313_p6 = scmp.lt.u32.totalorder %s3306_s20, %s4149_s13 }
  0xc1   : > { %p3309_p7 = pnand %p3307_p2, %p4209_p4 }
  0xc3   : > { %p3310_p1 = pneg %p3309_p7 }
  0xc5   : > { %p3315_p10 = pnand %p3313_p6, %p3310_p1 }
  0xc7   : > { %3318 = shalt.err (!%p3315_p10)
}
  0xc8   : > { %s3319_s27 = scalar_lea.vmem %s510_s2, 8192  ;;  %p3327_p8 = scmp.lt.s32.totalorder %s510_s2, %s510_s2 }
  0xc9   : > { %p3320_p13 = scmp.ne.s32.totalorder %s510_s2, %s3319_s27  ;;  %p3328_p0 = scmp.lt.s32.totalorder %s3319_s27, %s3319_s27 }
  0xcb   : > { %p3322_p3 = pnand %p3320_p13, %p4209_p4  ;;  %p3329_p9 = por %p3328_p0, %p3327_p8 }
  0xcd   : > { %p3323_p5 = pneg %p3322_p3 }
  0xcf   : > { %p3330_p11 = pnand %p3329_p9, %p3323_p5 }
  0xd1   : > { %3333 = shalt.err (!%p3330_p11)
}
  0xd2   : > { %2942 = dma.hbm_to_vmem [thread:$0]  (!%p4210_p12), %s4149_s13, 8192, %s510_s2, [#allocation15], %s3487_s16, %s3487_s16, %s3488_s10  }
  0xd3   : > { %p4211_p2 = scmp.ne.s32.totalorder %s4200_s26, 0 }
  0xd4   : > { %p4212_p4 = scmp.ne.s32.totalorder (!%p4211_p2), %s4205_s17, 0 }
  0xd5   : > { %528 = sbr.rel (%p4211_p2) target bundleno = 4132 (0x1024), region = 80 }
  0xdc   : > { %3411 = dma.done.wait (%p4212_p4), [#allocation6], 256  }
  0xdd   : > { %3413 = vsyncadd (%p4212_p4), [#allocation6], 4294967040  ;;  %p4213_p7 = scmp.ne.s32.totalorder %s4191_s14, 0 }
  0xdf   : > { %3415 = dma.done.wait (%p4213_p7), [#allocation9], 2064  }
  0xe0   : > { %3417 = vsyncadd (%p4213_p7), [#allocation9], 4294965232 }
  0xe1   : > { %3419 = dma.done.wait (%p4213_p7), [#allocation12], 6144  }
  0xe2   : > { %3421 = vsyncadd (%p4213_p7), [#allocation12], 4294961152 }
  0xe3   : > { %3423 = dma.done.wait (%p4213_p7), [#allocation15], 16384  }
  0xe4   : > { %3425 = vsyncadd (%p4213_p7), [#allocation15], 4294950912  ;;  %s592_s26 = sand.u32 1, %s3436_s19   ;;  %p2369_p12 = scmp.ne.s32.totalorder %s3456_s24, 0 }
  0xe5   : > { %s3896_s4 = sshll.u32 %s592_s26, 3  ;;  %s3900_s17 = smov (!%p2369_p12), 0  }
  0xe6   : > { %s594_s8 = scalar_lea.vmem [#allocation17], %s3896_s4  ;;  %598 = sbr.rel (%p2369_p12) target bundleno = 767 (0x2ff), region = 112 }
  0xed LB: >> { %s3906_s14 = sshll.u32 %s3476_s17, 3  ;;  %v637_v1 = vld [vmem:[#allocation11 + $0x8] sm:$0xff]  ;;  %v639_v2 = vld [vmem:[#allocation11 + $0x18] sm:$0xff]  ;;  %v636_v3 = vld [vmem:[#allocation11] sm:$0xff]  ;;  %v3491_v42 = vmov 0.0   ;;  %v670_v63 = vlaneseq  ;;  %s604_s17 = sadd.s32 1, %s3476_s17   ;;  %s3476_s17 = sphi %s3900_s17, %s604_s17  }
  0xee   : >> { %s606_s16 = scalar_lea.vmem [#allocation5], %s3906_s14  ;;  %v2657_v4 = vpack.c.bf16 %v639_v2, %v637_v1  ;;  %v638_v5 = vld [vmem:[#allocation11 + $0x10] sm:$0xff]  ;;  %v641_v6 = vld [vmem:[#allocation11 + $0x28] sm:$0xff]  ;;  %v643_v7 = vld [vmem:[#allocation11 + $0x38] sm:$0xff]  ;;  %744 = vmatprep.mubr.f32.mxu0 %v3491_v42  ;;  %s751_s28 = scalar_lea.vmem [#allocation2], %s3906_s14 }
  0xef   : >> { %v607_v0 = vld [vmem:[%s606_s16] sm:$0xff]  ;;  %v2659_v8 = vpack.c.bf16 %v638_v5, %v636_v3  ;;  %v2661_v9 = vpack.c.bf16 %v643_v7, %v641_v6  ;;  %v642_v11 = vld [vmem:[#allocation11 + $0x30] sm:$0xff]  ;;  %v647_v13 = vld [vmem:[#allocation11 + $0x58] sm:$0xff]  ;;  %s753_s20 = scalar_lea.vmem [#allocation3], %s3906_s14  ;;  %p601_p1 = scmp.ge.s32.totalorder %s604_s17, 2  }
  0xf0   : >> { %608 = vadd.xlane.f32.xlu0 %v607_v0  ;;  %v640_v10 = vld [vmem:[#allocation11 + $0x20] sm:$0xff]  ;;  %v645_v12 = vld [vmem:[#allocation11 + $0x48] sm:$0xff]  ;;  %2658 = vmatprep.subr.bf16.mxu0 %v2657_v4  ;;  %v646_v17 = vld [vmem:[#allocation11 + $0x50] sm:$0xff] }
  0xf1   : >> { %2660 = vmatpush1.bf16.msra.mxu0 %v2659_v8  ;;  %v2663_v14 = vpack.c.bf16 %v642_v11, %v640_v10  ;;  %v2665_v15 = vpack.c.bf16 %v647_v13, %v645_v12  ;;  %v644_v16 = vld [vmem:[#allocation11 + $0x40] sm:$0xff]  ;;  %v649_v23 = vld [vmem:[#allocation11 + $0x68] sm:$0xff]  ;;  %v651_v24 = vld [vmem:[#allocation11 + $0x78] sm:$0xff] }
  0xf2   : >> { %2662 = vmatprep.subr.bf16.mxu0 %v2661_v9  ;;  %v2667_v18 = vpack.c.bf16 %v646_v17, %v644_v16  ;;  %v2669_v25 = vpack.c.bf16 %v651_v24, %v649_v23  ;;  %v648_v26 = vld [vmem:[#allocation11 + $0x60] sm:$0xff]  ;;  %v650_v27 = vld [vmem:[#allocation11 + $0x70] sm:$0xff]  ;;  %v653_v29 = vld [vmem:[#allocation11 + $0x88] sm:$0xff] }
  0xf3   : >> { %v2671_v28 = vpack.c.bf16 %v650_v27, %v648_v26  ;;  %v655_v30 = vld [vmem:[#allocation11 + $0x98] sm:$0xff]  ;;  %v652_v32 = vld [vmem:[#allocation11 + $0x80] sm:$0xff]  ;;  %v654_v33 = vld [vmem:[#allocation11 + $0x90] sm:$0xff] }
  0xf4   : >> { %v2673_v31 = vpack.c.bf16 %v655_v30, %v653_v29  ;;  %v2675_v34 = vpack.c.bf16 %v654_v33, %v652_v32  ;;  %v657_v35 = vld [vmem:[#allocation11 + $0xa8] sm:$0xff]  ;;  %v659_v36 = vld [vmem:[#allocation11 + $0xb8] sm:$0xff]  ;;  %v656_v37 = vld [vmem:[#allocation11 + $0xa0] sm:$0xff] }
  0xf5   : >> { %2664 = vmatpush1.bf16.msra.mxu0 %v2663_v14  ;;  %v2677_v38 = vpack.c.bf16 %v659_v36, %v657_v35  ;;  %v658_v39 = vld [vmem:[#allocation11 + $0xb0] sm:$0xff]  ;;  %v661_v40 = vld [vmem:[#allocation11 + $0xc8] sm:$0xff]  ;;  %v663_v41 = vld [vmem:[#allocation11 + $0xd8] sm:$0xff] }
  0xf6   : >> { %2666 = vmatprep.subr.bf16.mxu0 %v2665_v15  ;;  %v2679_v43 = vpack.c.bf16 %v658_v39, %v656_v37  ;;  %v2681_v44 = vpack.c.bf16 %v663_v41, %v661_v40  ;;  %v660_v45 = vld [vmem:[#allocation11 + $0xc0] sm:$0xff]  ;;  %v662_v46 = vld [vmem:[#allocation11 + $0xd0] sm:$0xff]  ;;  %v665_v47 = vld [vmem:[#allocation11 + $0xe8] sm:$0xff] }
  0xf7   : >> { %v667_v48 = vld [vmem:[#allocation11 + $0xf8] sm:$0xff]  ;;  %v2683_v49 = vpack.c.bf16 %v662_v46, %v660_v45  ;;  %v664_v51 = vld [vmem:[#allocation11 + $0xe0] sm:$0xff]  ;;  %v666_v52 = vld [vmem:[#allocation11 + $0xf0] sm:$0xff] }
  0xf8   : >> { %v2685_v50 = vpack.c.bf16 %v667_v48, %v665_v47  ;;  %v2687_v53 = vpack.c.bf16 %v666_v52, %v664_v51  ;;  %v2371_v58 = vld [vmem:[%s4137_s1] ss:$0 sm:$0xff]  ;;  %v2372_v60 = vld [vmem:[#allocation8] ss:$0 sm:$0xff] }
  0xf9   : >> { %2668 = vmatpush1.bf16.msra.mxu0 %v2667_v18  ;;  %v668_v2 = vld [vmem:[%s4142_s6] sm:$0x3] }
  0xfa   : >> { %2670 = vmatprep.subr.bf16.mxu0 %v2669_v25 }
  0xfd   : >> { %2672 = vmatpush1.bf16.msra.mxu0 %v2671_v28 }
  0xfe   : >> { %2674 = vmatprep.subr.bf16.mxu0 %v2673_v31 }
 0x101   : >> { %2676 = vmatpush1.bf16.msra.mxu0 %v2675_v34 }
 0x102   : >> { %2678 = vmatprep.subr.bf16.mxu0 %v2677_v38 }
 0x105   : >> { %2680 = vmatpush1.bf16.msra.mxu0 %v2679_v43 }
 0x106   : >> { %2682 = vmatprep.subr.bf16.mxu0 %v2681_v44 }
 0x109   : >> { %2684 = vmatpush1.bf16.msra.mxu0 %v2683_v49 }
 0x10a   : >> { %2686 = vmatprep.subr.bf16.mxu0 %v2685_v50 }
 0x10d   : >> { %2688 = vmatpush1.bf16.msra.mxu0 %v2687_v53 }
 0x17d   : >> { %v609_v19 = vpop.xlane.xlu0 %608 }
 0x17e   : >> { %v611_v20 = vmul.f32 0.0078125, %v609_v19 }
 0x180   : >> { %v612_v21 = vsub.f32 %v607_v0, %v611_v20  ;;  %v671_v0 = vshrl.u32 %v670_v63, 7 }
 0x182   : >> { %v613_v22 = vmul.f32 %v612_v21, %v612_v21  ;;  %v672_v1 = vsub.s32 0, %v671_v0  ;;  %v676_v3 = vsub.s32 1, %v671_v0 }
 0x184   : >> { %614 = vadd.xlane.f32.xlu0 %v613_v22  ;;  %v673_v4 = vrot.slane %v668_v2, %v672_v1  ;;  %v677_v5 = vrot.slane %v668_v2, %v676_v3 }
 0x211   : >> { %v615_v54 = vpop.xlane.xlu0 %614 }
 0x212   : >> { %v616_v55 = vmul.f32 0.0078125, %v615_v54 }
 0x214   : >> { %v617_v56 = vadd.f32 1e-05, %v616_v55 }
 0x216   : >> { %3076 = vrsqrt.f32 %v617_v56 }
 0x220   : >> { %v3077_v57 = vpop.eup %3076 }
 0x221   : >> { %v619_v59 = vmul.f32 %v3077_v57, %v612_v21 }
 0x223   : >> { %v627_v61 = vmul.f32 %v2371_v58, %v619_v59 }
 0x225   : >> { %v635_v62 = vadd.f32 %v2372_v60, %v627_v61 }
 0x227   : >> { %745 = vmatmul.mubr.f32.vlgmr.msra.gmra.mrb[0].mxu0 %v635_v62 }
 0x2f8   : > { %603 = sbr.rel (!%p601_p1) target bundleno = 237 (0xed), region = 157 }
 0x2fa   : >> { %v746_v6 = vpop.f32.mrb[0].mxu0 }
 0x2fb   : >> { %v747_v7 = vadd.f32 %v746_v6, %v673_v4  ;;  %v748_v8 = vpop.f32.mrb[1].mxu0 }
 0x2fc   : >> { %v749_v9 = vadd.f32 %v748_v8, %v677_v5 }
 0x2fd   : >> { %752 = vst [vmem:[%s751_s28] sm:$0xff] %v747_v7 }
 0x2fe   : >> { %754 = vst [vmem:[%s753_s20] sm:$0xff] %v749_v9 }
 0x2ff PF: > { %s2373_s30 = sshll.u32 %s3456_s24, 3  ;;  %v786_v11 = vld [vmem:[#allocation10] sm:$0xff]  ;;  %v787_v12 = vld [vmem:[#allocation10 + $0x8] sm:$0xff]  ;;  %v788_v13 = vld [vmem:[#allocation10 + $0x10] sm:$0xff]  ;;  %v3492_v14 = vmov 0.0|0.0   ;;  %vm3493_vm0 = vmmov 0  }
 0x300   : > { %s756_s12 = scalar_lea.vmem [#allocation5], %s2373_s30  ;;  %2689 = vmatprep.subr.bf16.mxu0 %v3492_v14  ;;  %v2690_v15 = vpack.c.bf16 %v787_v12, %v786_v11  ;;  %v789_v16 = vld [vmem:[#allocation10 + $0x18] sm:$0xff]  ;;  %2713 = vmatprep.subr.bf16.mxu1 %v3492_v14  ;;  %v790_v18 = vld [vmem:[#allocation10 + $0x20] sm:$0xff]  ;;  %v791_v19 = vld [vmem:[#allocation10 + $0x28] sm:$0xff]  ;;  %v3494_v33 = vmov 0.0   ;;  %vm883_vm1 = vcmask 261120  }
 0x301   : > { %v3921_v10 = vld [vmem:[%s756_s12] sm:$0xff]  ;;  %v2693_v17 = vpack.c.bf16 %v789_v16, %v788_v13  ;;  %v2696_v20 = vpack.c.bf16 %v791_v19, %v790_v18  ;;  %v792_v25 = vld [vmem:[#allocation10 + $0x30] sm:$0xff]  ;;  %v793_v26 = vld [vmem:[#allocation10 + $0x38] sm:$0xff]  ;;  %2563 = vmatprep.mubr.msk.f32.mxu0 %vm3493_vm0, %v3494_v33  ;;  %2570 = vmatprep.mubr.msk.f32.mxu1 %vm3493_vm0, %v3494_v33  ;;  %s4216_s29 = sld [smem:[#allocation36_spill]]  ;;  %s3495_s17 = smov 96   ;;  %vm963_vm3 = vcmask 130048  }
 0x302   : > { %758 = vadd.xlane.f32.xlu0 %v3921_v10  ;;  %2691 = vmatpush3.bf16.msra.mxu0 %v2690_v15  ;;  %v2699_v27 = vpack.c.bf16 %v793_v26, %v792_v25  ;;  %v794_v28 = vld [vmem:[#allocation10 + $0x40] sm:$0xff]  ;;  %v795_v29 = vld [vmem:[#allocation10 + $0x48] sm:$0xff]  ;;  %v796_v31 = vld [vmem:[#allocation10 + $0x50] sm:$0xff]  ;;  %s3496_s14 = smov 64   ;;  %s3497_s16 = smov 32   ;;  %vm1233_vm4 = vcmask 523520  }
 0x303   : > { %2692 = vmatprep.subr.bf16.mxu0 %v3492_v14  ;;  %v2702_v30 = vpack.c.bf16 %v795_v29, %v794_v28  ;;  %v797_v32 = vld [vmem:[#allocation10 + $0x58] sm:$0xff]  ;;  %v798_v35 = vld [vmem:[#allocation10 + $0x60] sm:$0xff]  ;;  %v799_v36 = vld [vmem:[#allocation10 + $0x68] sm:$0xff]  ;;  %vm1419_vm5 = vcmask 785920   ;;  %vm1605_vm6 = vcmask 1048320   ;;  %s4217_s2 = sld [smem:[#allocation37_spill]] }
 0x304   : > { %v2705_v34 = vpack.c.bf16 %v797_v32, %v796_v31  ;;  %v2708_v37 = vpack.c.bf16 %v799_v36, %v798_v35  ;;  %v800_v38 = vld [vmem:[#allocation10 + $0x70] sm:$0xff]  ;;  %v801_v39 = vld [vmem:[#allocation10 + $0x78] sm:$0xff]  ;;  %v879_v41 = vld [vmem:[#allocation2] sm:$0xff]  ;;  %s4218_s20 = sld [smem:[#allocation38_spill]]  ;;  %s4219_s21 = sld [smem:[#allocation39_spill]] }
 0x305   : > { %v2711_v40 = vpack.c.bf16 %v801_v39, %v800_v38  ;;  %v880_v42 = vld [vmem:[#allocation2 + $0x8] sm:$0xff]  ;;  %vm3941_vm2 = vmpackc.low %vm883_vm1, %vm883_vm1  ;;  %v2374_v49 = vld [vmem:[%s4137_s1] ss:$0 sm:$0xff]  ;;  %s4220_s18 = sld [smem:[#allocation40_spill]]  ;;  %s4222_s10 = sld [smem:[#allocation31_spill]] }
 0x306   : > { %2694 = vmatpush3.bf16.msra.mxu0 %v2693_v17  ;;  %v2714_v43 = vpack.c.bf16 %v880_v42, %v879_v41  ;;  %v2375_v51 = vld [vmem:[#allocation8] ss:$0 sm:$0xff]  ;;  %v1051_v56 = vld [vmem:[#allocation3] sm:$0xff]  ;;  %v3964_v61 = vpack.i.bf16 %v880_v42, %v879_v41  ;;  %s2206_s9 = sshll.u32 %s594_s8, 4  ;;  %s3498_s23 = smov [#allocation17]   ;;  %s4072_s9 = int_to_ptr.vmem [resolvable:$true] %s2206_s9 }
 0x307   : > { %2695 = vmatprep.subr.bf16.mxu0 %v3492_v14  ;;  %v2376_v54 = vld [vmem:[%s4216_s29] ss:$0 sm:$0xff]  ;;  %v1052_v57 = vld [vmem:[#allocation3 + $0x8] sm:$0xff]  ;;  %s2398_s29 = sshll.u32 %s3460_s25, 1  ;;  %s3338_s27 = sshll.u32 %s3498_s23, 4  ;;  %s3339_s27 = int_to_ptr.vmem [resolvable:$false] %s3338_s27 }
 0x308   : > { %2716 = vmatpush3.bf16.xpose.msk.msra.mxu1 %vm3941_vm2, %v2714_v43  ;;  %v3958_v60 = vpack.i.bf16 %v1052_v57, %v1051_v56  ;;  %v2718_v1 = vpack.c.bf16 %v1052_v57, %v1051_v56  ;;  %s2202_s15 = sadd.s32 %s3456_s24, %s2398_s29  ;;  %s2191_s24 = scalar_lea.sflag [#allocation7], %s592_s26 }
 0x309   : > { %2717 = vmatprep.subr.bf16.mxu1 %v3492_v14  ;;  %p3341_p5 = scmp.lt.s32.totalorder %s4072_s9, %s3339_s27 }
 0x30a   : > { %2697 = vmatpush3.bf16.msra.mxu0 %v2696_v20 }
 0x30b   : > { %2698 = vmatprep.subr.bf16.mxu0 %v3492_v14  ;;  %p4225_p10 = scmp.ne.s32.totalorder %s4222_s10, 0 }
 0x30e   : > { %2700 = vmatpush3.bf16.msra.mxu0 %v2699_v27 }
 0x30f   : > { %2701 = vmatprep.subr.bf16.mxu0 %v3492_v14 }
 0x312   : > { %2703 = vmatpush3.bf16.msra.mxu0 %v2702_v30 }
 0x313   : > { %2704 = vmatprep.subr.bf16.mxu0 %v3492_v14 }
 0x316   : > { %2706 = vmatpush3.bf16.msra.mxu0 %v2705_v34 }
 0x317   : > { %2707 = vmatprep.subr.bf16.mxu0 %v3492_v14 }
 0x31a   : > { %2709 = vmatpush3.bf16.msra.mxu0 %v2708_v37 }
 0x31b   : > { %2710 = vmatprep.subr.bf16.mxu0 %v3492_v14 }
 0x31e   : > { %2712 = vmatpush3.bf16.msra.mxu0 %v2711_v40 }
 0x31f   : > { %2741 = vmatprep.subr.bf16.mxu0 %v3492_v14 }
 0x38f   : > { %v759_v21 = vpop.xlane.xlu0 %758 }
 0x390   : > { %v761_v22 = vmul.f32 0.0078125, %v759_v21 }
 0x392   : > { %v762_v23 = vsub.f32 %v3921_v10, %v761_v22 }
 0x394   : > { %v763_v24 = vmul.f32 %v762_v23, %v762_v23 }
 0x396   : > { %764 = vadd.xlane.f32.xlu0 %v763_v24 }
 0x423   : > { %v765_v45 = vpop.xlane.xlu0 %764 }
 0x424   : > { %v766_v46 = vmul.f32 0.0078125, %v765_v45 }
 0x426   : > { %v767_v47 = vadd.f32 1e-05, %v766_v46 }
 0x428   : > { %3108 = vrsqrt.f32 %v767_v47 }
 0x432   : > { %v3109_v48 = vpop.eup %3108 }
 0x433   : > { %v769_v50 = vmul.f32 %v3109_v48, %v762_v23 }
 0x435   : > { %v777_v52 = vmul.f32 %v2374_v49, %v769_v50 }
 0x437   : > { %v785_v53 = vadd.f32 %v2375_v51, %v777_v52 }
 0x439   : > { %2564 = vmatmul.mubr.f32.vlgmr.msra.gmra.mrb[0].mxu0 %v785_v53 }
 0x43a   : > { %2654 = vmatprep.mubr.msk.f32.mxu0 %vm3493_vm0, %v3494_v33 }
 0x50c   : > { %v875_v55 = vpop.f32.mrb[0].mxu0 }
 0x50d   : > { %v876_v58 = vadd.f32 %v2376_v54, %v875_v55  ;;  %v2565_v59 = vpop.f32.mrb[1].mxu0 }
 0x50f   : > { %1053 = vrot.lane.b32.xlu0 %v876_v58, %s3495_s17  ;;  %2571 = vmatmul.mubr.msk.f32.vlgmr.msra.gmra.mrb[0].mxu1 %vm883_vm1, %v876_v58 }
 0x510   : > { %2577 = vmatprep.mubr.msk.f32.mxu1 %vm3493_vm0, %v3494_v33  ;;  %2719 = vmatpush3.bf16.msra.mxu1 %v2718_v1 }
 0x511   : > { %2720 = vmatprep.subr.bf16.mxu1 %v3492_v14 }
 0x513   : > { %3084 = vrot.lane.b32.xlu0 %v3958_v60, %s3495_s17 }
 0x517   : > { %3089 = vrot.lane.b32.xlu0 %v3964_v61, %s3496_s14 }
 0x51b   : > { %1239 = vrot.lane.b32.xlu0 %v876_v58, %s3496_s14 }
 0x581   : > { %v1054_v8 = vpop.permute.xlu0 %1053 }
 0x585   : > { %v3085_v12 = vpop.permute.xlu0 %3084 }
 0x586   : > { %v3087_v13 = vunpack.i.h.bf16 %v3085_v12  ;;  %v3086_v15 = vunpack.i.l.bf16 %v3085_v12  ;;  %v1609_v12 = vld [vmem:[#allocation13 + $0x8] sm:$0xff] }
 0x588   : > { %v2725_v16 = vpack.c.bf16 %v3087_v13, %v3086_v15  ;;  %v1610_v13 = vld [vmem:[#allocation13 + $0x10] sm:$0xff] }
 0x589   : > { %v3090_v25 = vpop.permute.xlu0 %3089 }
 0x58a   : > { %v3092_v26 = vunpack.i.h.bf16 %v3090_v25  ;;  %v3091_v27 = vunpack.i.l.bf16 %v3090_v25  ;;  %v1617_v25 = vld [vmem:[#allocation13 + $0x48] sm:$0xff] }
 0x58c   : > { %v2728_v28 = vpack.c.bf16 %v3092_v26, %v3091_v27  ;;  %v1618_v27 = vld [vmem:[#allocation13 + $0x50] sm:$0xff] }
 0x58d   : > { %v1240_v35 = vpop.permute.xlu0 %1239 }
 0x5e2   : > { %v959_v62 = vpop.f32.mrb[0].mxu1 }
 0x5e3   : > { %v2572_v63 = vpop.f32.mrb[1].mxu1  ;;  %v964_v0 = vsel %vm963_vm3, %v959_v62, -inf }
 0x5e4   : > { %965 = vmax.xlane.f32.xlu1 %v964_v0 }
 0x5f5   : > { %3079 = vrot.lane.b32.xlu1 %v3964_v61, %s3495_s17 }
 0x671   : > { %v966_v2 = vpop.xlane.xlu1 %965 }
 0x672   : > { %v967_v3 = vsub.f32 %v959_v62, %v966_v2 }
 0x674   : > { %v968_v4 = vmul.f32 1.442695, %v967_v3 }
 0x675   : > { %v3080_v5 = vpop.permute.xlu1 %3079 }
 0x676   : > { %3110 = vpow2.f32 %v968_v4  ;;  %v3082_v6 = vunpack.i.h.bf16 %v3080_v5  ;;  %v3081_v7 = vunpack.i.l.bf16 %v3080_v5 }
 0x678   : > { %v2721_v9 = vpack.c.bf16 %v3082_v6, %v3081_v7 }
 0x680   : > { %v3973_v11 = vpop.eup %3110 }
 0x681   : > { %2578 = vmatmul.mubr.msk.f32.vlgmr.msra.gmra.mrb[2].mxu1 %vm963_vm3, %v3973_v11  ;;  %v970_v6 = vsel %vm963_vm3, %v3973_v11, 0.0  ;;  %v1614_v11 = vld [vmem:[#allocation13 + $0x30] sm:$0xff] }
 0x682   : > { %2723 = vmatpush3.bf16.xpose.msk.msra.mxu1 %vm3941_vm2, %v2721_v9  ;;  %2584 = vmatprep.mubr.msk.f32.mxu1 %vm3493_vm0, %v3494_v33  ;;  %v1608_v9 = vld [vmem:[#allocation13] sm:$0xff] }
 0x683   : > { %2724 = vmatprep.subr.bf16.mxu1 %v3492_v14  ;;  %v2742_v15 = vpack.c.bf16 %v1609_v12, %v1608_v9  ;;  %v1746_v9 = vld [vmem:[#allocation14 + $0x88] sm:$0xff] }
 0x684   : > { %v1750_v12 = vld [vmem:[#allocation14 + $0xa8] sm:$0xff] }
 0x685   : > { %2743 = vmatpush3.bf16.msra.mxu0 %v2742_v15  ;;  %v2773_v15 = vpack.c.bf16 %v1750_v12, %v1746_v9  ;;  %v1786_v12 = vld [vmem:[#allocation14 + $0x1c8] sm:$0xff] }
 0x686   : > { %2744 = vmatprep.subr.bf16.mxu0 %v3492_v14 }
 0x689   : > { %2585 = vmatmul.mubr.msk.f32.vlgmr.msra.gmra.mrb[4].mxu1 %vm883_vm1, %v1054_v8 }
 0x68a   : > { %2726 = vmatpush3.bf16.msra.mxu1 %v2725_v16  ;;  %2591 = vmatprep.mubr.msk.f32.mxu1 %vm3493_vm0, %v3494_v33  ;;  %v1611_v16 = vld [vmem:[#allocation13 + $0x18] sm:$0xff] }
 0x68b   : > { %2727 = vmatprep.subr.bf16.mxu1 %v3492_v14 }
 0x754   : > { %v3986_v17 = vpop.f32.mrb[2].mxu1 }
 0x755   : > { %v2579_v18 = vpop.f32.mrb[3].mxu1 }
 0x756   : > { %v2745_v18 = vpack.c.bf16 %v1611_v16, %v1610_v13  ;;  %v1748_v16 = vld [vmem:[#allocation14 + $0x98] sm:$0xff] }
 0x758   : > { %2746 = vmatpush3.bf16.msra.mxu0 %v2745_v18  ;;  %v1752_v18 = vld [vmem:[#allocation14 + $0xb8] sm:$0xff] }
 0x759   : > { %2747 = vmatprep.subr.bf16.mxu0 %v3492_v14 }
 0x75c   : > { %v1133_v19 = vpop.f32.mrb[4].mxu1 }
 0x75d   : > { %v2586_v20 = vpop.f32.mrb[5].mxu1  ;;  %v1137_v21 = vsel %vm963_vm3, %v1133_v19, -inf }
 0x75e   : > { %1138 = vmax.xlane.f32.xlu1 %v1137_v21  ;;  %v1613_v20 = vld [vmem:[#allocation13 + $0x28] sm:$0xff] }
 0x76f   : > { %3094 = vrot.lane.b32.xlu1 %v3958_v60, %s3496_s14 }
 0x773   : > { %1425 = vrot.lane.b32.xlu1 %v876_v58, %s3497_s16 }
 0x7eb   : > { %v1139_v22 = vpop.xlane.xlu1 %1138 }
 0x7ec   : > { %v1140_v23 = vsub.f32 %v1133_v19, %v1139_v22  ;;  %v1612_v19 = vld [vmem:[#allocation13 + $0x20] sm:$0xff]  ;;  %v1615_v22 = vld [vmem:[#allocation13 + $0x38] sm:$0xff] }
 0x7ed   : > { %v2748_v21 = vpack.c.bf16 %v1613_v20, %v1612_v19  ;;  %v1745_v19 = vld [vmem:[#allocation14 + $0x80] sm:$0xff]  ;;  %v2805_v20 = vpack.c.bf16 %v1752_v18, %v1748_v16 }
 0x7ee   : > { %v1141_v24 = vmul.f32 1.442695, %v1140_v23  ;;  %v2751_v23 = vpack.c.bf16 %v1615_v22, %v1614_v11  ;;  %v1747_v11 = vld [vmem:[#allocation14 + $0x90] sm:$0xff] }
 0x7ef   : > { %v3095_v30 = vpop.permute.xlu1 %3094  ;;  %2749 = vmatpush3.bf16.msra.mxu0 %v2748_v21  ;;  %v1749_v21 = vld [vmem:[#allocation14 + $0xa0] sm:$0xff]  ;;  %v1751_v22 = vld [vmem:[#allocation14 + $0xb0] sm:$0xff] }
 0x7f0   : > { %3112 = vpow2.f32 %v1141_v24  ;;  %v3097_v31 = vunpack.i.h.bf16 %v3095_v30  ;;  %v3096_v32 = vunpack.i.l.bf16 %v3095_v30  ;;  %2750 = vmatprep.subr.bf16.mxu0 %v3492_v14  ;;  %v1616_v24 = vld [vmem:[#allocation13 + $0x40] sm:$0xff] }
 0x7f1   : > { %v2754_v26 = vpack.c.bf16 %v1617_v25, %v1616_v24  ;;  %v2807_v24 = vpack.c.bf16 %v1751_v22, %v1747_v11  ;;  %v1787_v22 = vld [vmem:[#allocation14 + $0x1d0] sm:$0xff] }
 0x7f2   : > { %v2732_v34 = vpack.c.bf16 %v3097_v31, %v3096_v32 }
 0x7f3   : > { %v1426_v55 = vpop.permute.xlu1 %1425  ;;  %2752 = vmatpush3.bf16.msra.mxu0 %v2751_v23  ;;  %v2775_v23 = vpack.c.bf16 %v1749_v21, %v1745_v19  ;;  %v1792_v19 = vld [vmem:[#allocation14 + $0x1f8] sm:$0xff]  ;;  %v1789_v21 = vld [vmem:[#allocation14 + $0x1e0] sm:$0xff] }
 0x7f4   : > { %2753 = vmatprep.subr.bf16.mxu0 %v3492_v14 }
 0x7f7   : > { %2755 = vmatpush3.bf16.msra.mxu0 %v2754_v26 }
 0x7f8   : > { %2756 = vmatprep.subr.bf16.mxu0 %v3492_v14 }
 0x7fa   : > { %v3113_v29 = vpop.eup %3112 }
 0x7fb   : > { %2592 = vmatmul.mubr.msk.f32.vlgmr.msra.gmra.mrb[6].mxu1 %vm963_vm3, %v3113_v29  ;;  %v1143_v41 = vsel %vm963_vm3, %v3113_v29, 0.0 }
 0x7fc   : > { %2730 = vmatpush3.bf16.xpose.msk.msra.mxu1 %vm3941_vm2, %v2728_v28  ;;  %2598 = vmatprep.mubr.msk.f32.mxu1 %vm3493_vm0, %v3494_v33  ;;  %v1619_v28 = vld [vmem:[#allocation13 + $0x58] sm:$0xff] }
 0x7fd   : > { %2731 = vmatprep.subr.bf16.mxu1 %v3492_v14  ;;  %v2757_v29 = vpack.c.bf16 %v1619_v28, %v1618_v27 }
 0x7ff   : > { %2758 = vmatpush3.bf16.msra.mxu0 %v2757_v29  ;;  %v1754_v29 = vld [vmem:[#allocation14 + $0xc8] sm:$0xff] }
 0x800   : > { %2759 = vmatprep.subr.bf16.mxu0 %v3492_v14 }
 0x803   : > { %2599 = vmatmul.mubr.msk.f32.vlgmr.msra.gmra.mrb[8].mxu1 %vm883_vm1, %v1240_v35 }
 0x804   : > { %2733 = vmatpush3.bf16.msra.mxu1 %v2732_v34  ;;  %2605 = vmatprep.mubr.msk.f32.mxu1 %vm3493_vm0, %v3494_v33 }
 0x805   : > { %2734 = vmatprep.subr.bf16.mxu1 %v3492_v14 }
 0x8ce   : > { %v1223_v36 = vpop.f32.mrb[6].mxu1 }
 0x8cf   : > { %v2593_v37 = vpop.f32.mrb[7].mxu1 }
 0x8d0   : > { %v1620_v37 = vld [vmem:[#allocation13 + $0x60] sm:$0xff] }
 0x8d6   : > { %v1319_v38 = vpop.f32.mrb[8].mxu1 }
 0x8d7   : > { %v2600_v39 = vpop.f32.mrb[9].mxu1  ;;  %v1323_v40 = vsel %vm963_vm3, %v1319_v38, -inf }
 0x8d8   : > { %1324 = vmax.xlane.f32.xlu0 %v1323_v40  ;;  %v1622_v40 = vld [vmem:[#allocation13 + $0x70] sm:$0xff] }
 0x8ee   : > { %3099 = vrot.lane.b32.xlu0 %v3964_v61, %s3497_s16 }
 0x8f2   : > { %3104 = vrot.lane.b32.xlu0 %v3958_v60, %s3497_s16 }
 0x911   : > { %1144 = vadd.xlane.f32.xlu0 %v1143_v41  ;;  %v1623_v41 = vld [vmem:[#allocation13 + $0x78] sm:$0xff] }
 0x965   : > { %v1325_v42 = vpop.xlane.xlu0 %1324 }
 0x966   : > { %v1326_v43 = vsub.f32 %v1319_v38, %v1325_v42  ;;  %v1621_v38 = vld [vmem:[#allocation13 + $0x68] sm:$0xff]  ;;  %v2763_v42 = vpack.c.bf16 %v1623_v41, %v1622_v40  ;;  %v1759_v40 = vld [vmem:[#allocation14 + $0xf0] sm:$0xff] }
 0x967   : > { %v2760_v39 = vpack.c.bf16 %v1621_v38, %v1620_v37 }
 0x968   : > { %v1327_v45 = vmul.f32 1.442695, %v1326_v43 }
 0x969   : > { %v3100_v46 = vpop.permute.xlu0 %3099  ;;  %2761 = vmatpush3.bf16.msra.mxu0 %v2760_v39  ;;  %v1755_v39 = vld [vmem:[#allocation14 + $0xd0] sm:$0xff] }
 0x96a   : > { %3114 = vpow2.f32 %v1327_v45  ;;  %v3102_v47 = vunpack.i.h.bf16 %v3100_v46  ;;  %v3101_v48 = vunpack.i.l.bf16 %v3100_v46  ;;  %2762 = vmatprep.subr.bf16.mxu0 %v3492_v14  ;;  %v2811_v41 = vpack.c.bf16 %v1759_v40, %v1755_v39  ;;  %v2395_v39 = vld [vmem:[%s4219_s21] ss:$0 sm:$0xff]  ;;  %s3334_s21 = scalar_lea.vmem %s4072_s9, 128 }
 0x96b   : > { %v1977_v40 = vld [vmem:[#allocation16] sm:$0xff]  ;;  %p3335_p6 = scmp.ne.s32.totalorder %s4072_s9, %s3334_s21 }
 0x96c   : > { %v2735_v49 = vpack.c.bf16 %v3102_v47, %v3101_v48 }
 0x96d   : > { %v3105_v51 = vpop.permute.xlu0 %3104  ;;  %2764 = vmatpush3.bf16.msra.mxu0 %v2763_v42  ;;  %v1762_v42 = vld [vmem:[#allocation14 + $0x108] sm:$0xff]  ;;  %p3336_p13 = pnand %p3335_p6, %p4225_p10 }
 0x96e   : > { %v3107_v52 = vunpack.i.h.bf16 %v3105_v51  ;;  %v3106_v53 = vunpack.i.l.bf16 %v3105_v51 }
 0x96f   : > { %p3337_p3 = pneg %p3336_p13 }
 0x970   : > { %v2739_v54 = vpack.c.bf16 %v3107_v52, %v3106_v53  ;;  %v1730_v53 = vld [vmem:[#allocation14 + $0x8] sm:$0xff] }
 0x974   : > { %v3115_v50 = vpop.eup %3114 }
 0x975   : > { %2606 = vmatmul.mubr.msk.f32.vlgmr.msra.gmra.mrb[10].mxu1 %vm963_vm3, %v3115_v50  ;;  %v1329_v60 = vsel %vm963_vm3, %v3115_v50, 0.0 }
 0x976   : > { %2737 = vmatpush3.bf16.xpose.msk.msra.mxu1 %vm3941_vm2, %v2735_v49  ;;  %2612 = vmatprep.mubr.msk.f32.mxu1 %vm3493_vm0, %v3494_v33  ;;  %v2393_v49 = vld [vmem:[%s4217_s2] ss:$0 sm:$0xff]  ;;  %s2399_s2 = sshll.u32 %s2202_s15, 7 }
 0x977   : > { %2738 = vmatprep.subr.bf16.mxu1 %v3492_v14 }
 0x97d   : > { %2613 = vmatmul.mubr.msk.f32.vlgmr.msra.gmra.mrb[12].mxu1 %vm883_vm1, %v1426_v55  ;;  %v1732_v55 = vld [vmem:[#allocation14 + $0x18] sm:$0xff] }
 0x97e   : > { %2740 = vmatpush3.bf16.msra.mxu1 %v2739_v54  ;;  %2619 = vmatprep.mubr.msk.f32.mxu1 %vm3493_vm0, %v3494_v33  ;;  %v1734_v54 = vld [vmem:[#allocation14 + $0x28] sm:$0xff] }
 0x99e   : > { %v1145_v5 = vpop.xlane.xlu0 %1144 }
 0xa48   : > { %v1409_v56 = vpop.f32.mrb[10].mxu1 }
 0xa49   : > { %v2607_v57 = vpop.f32.mrb[11].mxu1 }
 0xa4a   : > { %v1736_v57 = vld [vmem:[#allocation14 + $0x38] sm:$0xff] }
 0xa50   : > { %v1505_v58 = vpop.f32.mrb[12].mxu1 }
 0xa51   : > { %v2614_v44 = vpop.f32.mrb[13].mxu1  ;;  %v1509_v59 = vsel %vm963_vm3, %v1505_v58, -inf }
 0xa52   : > { %1510 = vmax.xlane.f32.xlu1 %v1509_v59  ;;  %v1733_v44 = vld [vmem:[#allocation14 + $0x20] sm:$0xff] }
 0xa56   : > { %1330 = vadd.xlane.f32.xlu1 %v1329_v60  ;;  %v1731_v60 = vld [vmem:[#allocation14 + $0x10] sm:$0xff] }
 0xadf   : > { %v1511_v61 = vpop.xlane.xlu1 %1510 }
 0xae0   : > { %v1512_v62 = vsub.f32 %v1505_v58, %v1511_v61  ;;  %v1729_v58 = vld [vmem:[#allocation14] sm:$0xff]  ;;  %v1735_v61 = vld [vmem:[#allocation14 + $0x30] sm:$0xff] }
 0xae1   : > { %v2767_v59 = vpack.c.bf16 %v1733_v44, %v1729_v58 }
 0xae2   : > { %v1513_v63 = vmul.f32 1.442695, %v1512_v62  ;;  %v1738_v62 = vld [vmem:[#allocation14 + $0x48] sm:$0xff] }
 0xae3   : > { %v1331_v0 = vpop.xlane.xlu1 %1330 }
 0xae4   : > { %3116 = vpow2.f32 %v1513_v63  ;;  %v2799_v63 = vpack.c.bf16 %v1735_v61, %v1731_v60  ;;  %v1771_v60 = vld [vmem:[#allocation14 + $0x150] sm:$0xff] }
 0xae5   : > { %3118 = vrcp.f32 %v1331_v0  ;;  %v1742_v0 = vld [vmem:[#allocation14 + $0x68] sm:$0xff] }
 0xae6   : > { %3120 = vrcp.f32 %v1145_v5  ;;  %v1741_v5 = vld [vmem:[#allocation14 + $0x60] sm:$0xff] }
 0xaee   : > { %v3117_v1 = vpop.eup %3116 }
 0xaef   : > { %v3119_v2 = vpop.eup %3118  ;;  %2620 = vmatmul.mubr.msk.f32.vlgmr.msra.gmra.mrb[14].mxu1 %vm963_vm3, %v3117_v1  ;;  %v1515_v3 = vsel %vm963_vm3, %v3117_v1, 0.0  ;;  %v1740_v1 = vld [vmem:[#allocation14 + $0x58] sm:$0xff] }
 0xaf0   : > { %1516 = vadd.xlane.f32.xlu1 %v1515_v3  ;;  %v1414_v4 = vmul.f32 %v3119_v2, %v1409_v56  ;;  %1879 = vmatprep.mubr.f32.mxu1 %v3494_v33  ;;  %v3121_v7 = vpop.eup %3120  ;;  %v2765_v56 = vpack.c.bf16 %v1734_v54, %v1730_v53  ;;  %v2769_v2 = vpack.c.bf16 %v1742_v0, %v1738_v62  ;;  %v1770_v53 = vld [vmem:[#allocation14 + $0x148] sm:$0xff]  ;;  %v1775_v62 = vld [vmem:[#allocation14 + $0x170] sm:$0xff] }
 0xaf1   : > { %v1228_v8 = vmul.f32 %v3121_v7, %v1223_v36  ;;  %v1782_v0 = vld [vmem:[#allocation14 + $0x1a8] sm:$0xff] }
 0xaf2   : > { %1416 = vrot.lane.b32.xlu0 %v1414_v4, %s3496_s14  ;;  %2766 = vmatprep.subr.bf16.mxu1 %v2765_v56  ;;  %v1737_v4 = vld [vmem:[#allocation14 + $0x40] sm:$0xff]  ;;  %v1772_v56 = vld [vmem:[#allocation14 + $0x158] sm:$0xff] }
 0xaf3   : > { %2768 = vmatpush1.bf16.msra.mxu1 %v2767_v59  ;;  %v2771_v7 = vpack.c.bf16 %v1741_v5, %v1737_v4  ;;  %v1773_v59 = vld [vmem:[#allocation14 + $0x160] sm:$0xff] }
 0xaf4   : > { %971 = vadd.xlane.f32.xlu1 %v970_v6  ;;  %v1739_v6 = vld [vmem:[#allocation14 + $0x50] sm:$0xff]  ;;  %2770 = vmatprep.subr.bf16.mxu1 %v2769_v2  ;;  %v1780_v2 = vld [vmem:[#allocation14 + $0x198] sm:$0xff]  ;;  %v1777_v4 = vld [vmem:[#allocation14 + $0x180] sm:$0xff] }
 0xaf7   : > { %2772 = vmatpush1.bf16.msra.mxu1 %v2771_v7  ;;  %v1779_v7 = vld [vmem:[#allocation14 + $0x190] sm:$0xff] }
 0xaf8   : > { %2774 = vmatprep.subr.bf16.mxu1 %v2773_v15  ;;  %v1788_v15 = vld [vmem:[#allocation14 + $0x1d8] sm:$0xff] }
 0xaf9   : > { %v2825_v11 = vpack.c.bf16 %v1792_v19, %v1788_v15  ;;  %v2016_v19 = vld [vmem:[#allocation16 + $0x138] sm:$0xff] }
 0xafb   : > { %2776 = vmatpush1.bf16.msra.mxu1 %v2775_v23  ;;  %v1791_v23 = vld [vmem:[#allocation14 + $0x1f0] sm:$0xff] }
 0xb05   : > { %1230 = vrot.lane.b32.xlu1 %v1228_v8, %s3497_s16  ;;  %v1743_v8 = vld [vmem:[#allocation14 + $0x70] sm:$0xff]  ;;  %s4221_s16 = sld [smem:[#allocation41_spill]] }
 0xb06   : > { %v2803_v13 = vpack.c.bf16 %v1743_v8, %v1739_v6  ;;  %v1781_v6 = vld [vmem:[#allocation14 + $0x1a0] sm:$0xff]  ;;  %v1783_v8 = vld [vmem:[#allocation14 + $0x1b0] sm:$0xff] }
 0xb07   : > { %v2791_v9 = vpack.c.bf16 %v1781_v6, %v1777_v4  ;;  %v2823_v16 = vpack.c.bf16 %v1783_v8, %v1779_v7  ;;  %v2000_v6 = vld [vmem:[#allocation16 + $0xb8] sm:$0xff]  ;;  %v2031_v7 = vld [vmem:[#allocation16 + $0x1b0] sm:$0xff] }
 0xb64   : > { %v1417_v36 = vpop.permute.xlu0 %1416 }
 0xb7d   : > { %v1517_v30 = vpop.xlane.xlu1 %1516 }
 0xb81   : > { %v972_v31 = vpop.xlane.xlu1 %971 }
 0xb82   : > { %3122 = vrcp.f32 %v972_v31  ;;  %v1756_v31 = vld [vmem:[#allocation14 + $0xd8] sm:$0xff] }
 0xb83   : > { %3124 = vrcp.f32 %v1517_v30  ;;  %v1758_v30 = vld [vmem:[#allocation14 + $0xe8] sm:$0xff] }
 0xb85   : > { %v1231_v35 = vpop.permute.xlu1 %1230 }
 0xb8c   : > { %v3123_v32 = vpop.eup %3122 }
 0xb8d   : > { %v1047_v34 = vmul.f32 %v3123_v32, %v3986_v17  ;;  %v3125_v17 = vpop.eup %3124  ;;  %v2777_v32 = vpack.c.bf16 %v1758_v30, %v1754_v29  ;;  %v2025_v29 = vld [vmem:[#allocation16 + $0x180] sm:$0xff] }
 0xb8f   : > { %1048 = vst.msk [vmem:[#allocation4] sm:$0xff] %vm883_vm1, %v1047_v34  ;;  %v1760_v34 = vld [vmem:[#allocation14 + $0xf8] sm:$0xff]  ;;  %2778 = vmatprep.subr.bf16.mxu1 %v2777_v32 }
 0xb90   : > { %1234 = vst.msk [vmem:[#allocation4] sm:$0xff] %vm1233_vm4, %v1231_v35  ;;  %v1753_v35 = vld [vmem:[#allocation14 + $0xc0] sm:$0xff]  ;;  %v2809_v37 = vpack.c.bf16 %v1760_v34, %v1756_v31  ;;  %v2026_v31 = vld [vmem:[#allocation16 + $0x188] sm:$0xff] }
 0xb91   : > { %1420 = vst.msk [vmem:[#allocation4] sm:$0xff] %vm1419_vm5, %v1417_v36  ;;  %v1757_v36 = vld [vmem:[#allocation14 + $0xe0] sm:$0xff]  ;;  %v2861_v32 = vpack.c.bf16 %v2026_v31, %v2025_v29  ;;  %v2018_v31 = vld [vmem:[#allocation16 + $0x148] sm:$0xff] }
 0xb92   : > { %v2779_v38 = vpack.c.bf16 %v1757_v36, %v1753_v35 }
 0xb94   : > { %2780 = vmatpush1.bf16.msra.mxu1 %v2779_v38 }
 0xbc2   : > { %v1595_v43 = vpop.f32.mrb[14].mxu1 }
 0xbc3   : > { %v1600_v45 = vmul.f32 %v3125_v17, %v1595_v43  ;;  %v2621_v46 = vpop.f32.mrb[15].mxu1  ;;  %v1766_v17 = vld [vmem:[#allocation14 + $0x128] sm:$0xff]  ;;  %v1764_v43 = vld [vmem:[#allocation14 + $0x118] sm:$0xff] }
 0xbc4   : > { %v1768_v46 = vld [vmem:[#allocation14 + $0x138] sm:$0xff] }
 0xbc5   : > { %1602 = vrot.lane.b32.xlu1 %v1600_v45, %s3495_s17  ;;  %v2781_v45 = vpack.c.bf16 %v1766_v17, %v1762_v42  ;;  %v2009_v17 = vld [vmem:[#allocation16 + $0x100] sm:$0xff] }
 0xbc7   : > { %2782 = vmatprep.subr.bf16.mxu1 %v2781_v45  ;;  %v1995_v45 = vld [vmem:[#allocation16 + $0x90] sm:$0xff] }
 0xc37   : > { %v1603_v47 = vpop.permute.xlu1 %1602 }
 0xc38   : > { %1606 = vst.msk [vmem:[#allocation4] sm:$0xff] %vm1605_vm6, %v1603_v47  ;;  %v1761_v47 = vld [vmem:[#allocation14 + $0x100] sm:$0xff] }
 0xc3f   : > { %v1607_v48 = vld [vmem:[#allocation4] sm:$0xff] }
 0xc40   : > { %2655 = vmatmul.mubr.f32.vlgmr.msra.gmra.mrb[2].mxu0 %v1607_v48  ;;  %v1765_v48 = vld [vmem:[#allocation14 + $0x120] sm:$0xff] }
 0xc41   : > { %1950 = vmatprep.mubr.f32.mxu0 %v3494_v33  ;;  %v2797_v33 = vpack.c.bf16 %v1736_v57, %v1732_v55  ;;  %v1774_v55 = vld [vmem:[#allocation14 + $0x168] sm:$0xff]  ;;  %v1776_v57 = vld [vmem:[#allocation14 + $0x178] sm:$0xff] }
 0xc42   : > { %v2785_v58 = vpack.c.bf16 %v1774_v55, %v1770_v53  ;;  %v2817_v44 = vpack.c.bf16 %v1776_v57, %v1772_v56  ;;  %v1980_v53 = vld [vmem:[#allocation16 + $0x18] sm:$0xff]  ;;  %v2011_v57 = vld [vmem:[#allocation16 + $0x110] sm:$0xff] }
 0xc43   : > { %2798 = vmatprep.subr.bf16.mxu0 %v2797_v33  ;;  %v1769_v33 = vld [vmem:[#allocation14 + $0x140] sm:$0xff] }
 0xc44   : > { %2800 = vmatpush1.bf16.msra.mxu0 %v2799_v63  ;;  %v2787_v61 = vpack.c.bf16 %v1773_v59, %v1769_v33  ;;  %v1778_v63 = vld [vmem:[#allocation14 + $0x188] sm:$0xff]  ;;  %v2029_v59 = vld [vmem:[#allocation16 + $0x1a0] sm:$0xff] }
 0xc45   : > { %v1998_v33 = vld [vmem:[#allocation16 + $0xa8] sm:$0xff] }
 0xd13   : > { %v1697_v50 = vpop.f32.mrb[2].mxu0 }
 0xd14   : > { %v1698_v14 = vadd.f32 %v2393_v49, %v1697_v50  ;;  %v2656_v51 = vpop.f32.mrb[3].mxu0  ;;  %v2813_v49 = vpack.c.bf16 %v1768_v46, %v1764_v43  ;;  %v2783_v50 = vpack.c.bf16 %v1765_v48, %v1761_v47  ;;  %v2010_v43 = vld [vmem:[#allocation16 + $0x108] sm:$0xff]  ;;  %v1996_v46 = vld [vmem:[#allocation16 + $0x98] sm:$0xff]  ;;  %v2027_v47 = vld [vmem:[#allocation16 + $0x190] sm:$0xff] }
 0xd15   : > { %v1767_v51 = vld [vmem:[#allocation14 + $0x130] sm:$0xff]  ;;  %v2028_v48 = vld [vmem:[#allocation16 + $0x198] sm:$0xff]  ;;  %v2833_v55 = vpack.c.bf16 %v1996_v46, %v1995_v45  ;;  %v2005_v46 = vld [vmem:[#allocation16 + $0xe0] sm:$0xff] }
 0xd16   : > { %v4041_v52 = vadd.f32 %v1698_v14, %v3921_v10  ;;  %v1744_v10 = vld [vmem:[#allocation14 + $0x78] sm:$0xff]  ;;  %v1763_v14 = vld [vmem:[#allocation14 + $0x110] sm:$0xff]  ;;  %2784 = vmatpush1.bf16.msra.mxu1 %v2783_v50  ;;  %v2865_v56 = vpack.c.bf16 %v2028_v48, %v2027_v47  ;;  %v2006_v47 = vld [vmem:[#allocation16 + $0xe8] sm:$0xff] }
 0xd17   : > { %v2801_v3 = vpack.c.bf16 %v1744_v10, %v1740_v1  ;;  %v2815_v54 = vpack.c.bf16 %v1767_v51, %v1763_v14  ;;  %2786 = vmatprep.subr.bf16.mxu1 %v2785_v58  ;;  %v2819_v1 = vpack.c.bf16 %v1775_v62, %v1771_v60  ;;  %v2789_v10 = vpack.c.bf16 %v1782_v0, %v1778_v63  ;;  %v1979_v51 = vld [vmem:[#allocation16 + $0x10] sm:$0xff]  ;;  %v2012_v58 = vld [vmem:[#allocation16 + $0x118] sm:$0xff]  ;;  %v1981_v62 = vld [vmem:[#allocation16 + $0x20] sm:$0xff] }
 0xd18   : > { %1702 = vadd.xlane.f32.xlu1 %v4041_v52  ;;  %v2863_v14 = vpack.c.bf16 %v2010_v43, %v2009_v17  ;;  %v2835_v60 = vpack.c.bf16 %v1980_v53, %v1979_v51  ;;  %v2019_v17 = vld [vmem:[#allocation16 + $0x150] sm:$0xff]  ;;  %v2020_v43 = vld [vmem:[#allocation16 + $0x158] sm:$0xff]  ;;  %v2037_v48 = vld [vmem:[#allocation16 + $0x1e0] sm:$0xff] }
 0xd19   : > { %2802 = vmatprep.subr.bf16.mxu0 %v2801_v3  ;;  %v1784_v3 = vld [vmem:[#allocation14 + $0x1b8] sm:$0xff]  ;;  %v2883_v45 = vpack.c.bf16 %v2020_v43, %v2019_v17  ;;  %v1990_v51 = vld [vmem:[#allocation16 + $0x68] sm:$0xff] }
 0xd1a   : > { %2804 = vmatpush1.bf16.msra.mxu0 %v2803_v13  ;;  %v2821_v5 = vpack.c.bf16 %v1784_v3, %v1780_v2  ;;  %2788 = vmatpush1.bf16.msra.mxu1 %v2787_v61  ;;  %v1790_v13 = vld [vmem:[#allocation14 + $0x1e8] sm:$0xff]  ;;  %v2867_v61 = vpack.c.bf16 %v2012_v58, %v2011_v57  ;;  %v2007_v58 = vld [vmem:[#allocation16 + $0xf0] sm:$0xff] }
 0xd1b   : > { %2806 = vmatprep.subr.bf16.mxu0 %v2805_v20  ;;  %2790 = vmatprep.subr.bf16.mxu1 %v2789_v10  ;;  %v2793_v18 = vpack.c.bf16 %v1790_v13, %v1786_v12  ;;  %v1785_v20 = vld [vmem:[#allocation14 + $0x1c0] sm:$0xff]  ;;  %v2014_v2 = vld [vmem:[#allocation16 + $0x128] sm:$0xff]  ;;  %v1983_v12 = vld [vmem:[#allocation16 + $0x30] sm:$0xff] }
 0xd1c   : > { %v2013_v10 = vld [vmem:[#allocation16 + $0x120] sm:$0xff]  ;;  %v1984_v13 = vld [vmem:[#allocation16 + $0x38] sm:$0xff] }
 0xd1d   : > { %v2871_v4 = vpack.c.bf16 %v2014_v2, %v2013_v10  ;;  %v1795_v2 = vlaneseq }
 0xd1e   : > { %2808 = vmatpush1.bf16.msra.mxu0 %v2807_v24  ;;  %2792 = vmatpush1.bf16.msra.mxu1 %v2791_v9  ;;  %v2795_v24 = vpack.c.bf16 %v1789_v21, %v1785_v20  ;;  %v2032_v9 = vld [vmem:[#allocation16 + $0x1b8] sm:$0xff]  ;;  %v2001_v21 = vld [vmem:[#allocation16 + $0xc0] sm:$0xff] }
 0xd1f   : > { %2810 = vmatprep.subr.bf16.mxu0 %v2809_v37  ;;  %2794 = vmatprep.subr.bf16.mxu1 %v2793_v18  ;;  %v2394_v37 = vld [vmem:[%s4218_s20] ss:$0 sm:$0xff]  ;;  %v2873_v15 = vpack.c.bf16 %v2032_v9, %v2031_v7  ;;  %v2015_v18 = vld [vmem:[#allocation16 + $0x130] sm:$0xff]  ;;  %s4223_s20 = sld [smem:[#allocation42_spill]] }
 0xd20   : > { %v2875_v20 = vpack.c.bf16 %v2016_v19, %v2015_v18 }
 0xd22   : > { %2812 = vmatpush1.bf16.msra.mxu0 %v2811_v41  ;;  %2796 = vmatpush1.bf16.msra.mxu1 %v2795_v24  ;;  %v1978_v41 = vld [vmem:[#allocation16 + $0x8] sm:$0xff] }
 0xd23   : > { %2814 = vmatprep.subr.bf16.mxu0 %v2813_v49  ;;  %v2831_v50 = vpack.c.bf16 %v1978_v41, %v1977_v40  ;;  %v2034_v24 = vld [vmem:[#allocation16 + $0x1c8] sm:$0xff]  ;;  %v1988_v40 = vld [vmem:[#allocation16 + $0x58] sm:$0xff] }
 0xd25   : > { %s4224_s30 = smov %s4223_s20  ;;  %s4070_s12 = scalar_lea.hbm %s4223_s20, %s2399_s2 }
 0xd26   : > { %2816 = vmatpush1.bf16.msra.mxu0 %v2815_v54 }
 0xd27   : > { %2818 = vmatprep.subr.bf16.mxu0 %v2817_v44  ;;  %v1997_v44 = vld [vmem:[#allocation16 + $0xa0] sm:$0xff] }
 0xd28   : > { %v2837_v63 = vpack.c.bf16 %v1998_v33, %v1997_v44  ;;  %v2008_v44 = vld [vmem:[#allocation16 + $0xf8] sm:$0xff]  ;;  %v2039_v33 = vld [vmem:[#allocation16 + $0x1f0] sm:$0xff] }
 0xd2a   : > { %2820 = vmatpush1.bf16.msra.mxu0 %v2819_v1  ;;  %v1982_v1 = vld [vmem:[#allocation16 + $0x28] sm:$0xff] }
 0xd2b   : > { %2822 = vmatprep.subr.bf16.mxu0 %v2821_v5  ;;  %v2839_v3 = vpack.c.bf16 %v1982_v1, %v1981_v62  ;;  %v1999_v5 = vld [vmem:[#allocation16 + $0xb0] sm:$0xff]  ;;  %v2024_v1 = vld [vmem:[#allocation16 + $0x178] sm:$0xff] }
 0xd2c   : > { %v2841_v8 = vpack.c.bf16 %v2000_v6, %v1999_v5  ;;  %v1793_v6 = vld [vmem:[%s4220_s18] sm:$0xf]  ;;  %s3340_s18 = scalar_lea.vmem %s3339_s27, 256 }
 0xd2d   : > { %p3342_p8 = scmp.lt.s32.totalorder %s3340_s18, %s3334_s21 }
 0xd2e   : > { %2824 = vmatpush1.bf16.msra.mxu0 %v2823_v16  ;;  %v2843_v16 = vpack.c.bf16 %v1984_v13, %v1983_v12 }
 0xd2f   : > { %2826 = vmatprep.subr.bf16.mxu0 %v2825_v11  ;;  %v2002_v11 = vld [vmem:[#allocation16 + $0xc8] sm:$0xff]  ;;  %p3343_p0 = por %p3342_p8, %p3341_p5 }
 0xd31   : > { %p3344_p9 = pnand %p3343_p0, %p3337_p3 }
 0xda5   : > { %v1703_v25 = vpop.xlane.xlu1 %1702 }
 0xda6   : > { %v1704_v26 = vmul.f32 0.0078125, %v1703_v25  ;;  %v2827_v25 = vpack.c.bf16 %v1791_v23, %v1787_v22  ;;  %v2033_v22 = vld [vmem:[#allocation16 + $0x1c0] sm:$0xff]  ;;  %v2845_v23 = vpack.c.bf16 %v2002_v11, %v2001_v21 }
 0xda8   : > { %v4045_v27 = vsub.f32 %v4041_v52, %v1704_v26  ;;  %2828 = vmatpush1.bf16.msra.mxu0 %v2827_v25  ;;  %v1993_v26 = vld [vmem:[#allocation16 + $0x80] sm:$0xff] }
 0xda9   : > { %2862 = vmatprep.subr.bf16.mxu0 %v2861_v32  ;;  %v1985_v25 = vld [vmem:[#allocation16 + $0x40] sm:$0xff] }
 0xdaa   : > { %v1706_v28 = vmul.f32 %v4045_v27, %v4045_v27 }
 0xdac   : > { %1707 = vadd.xlane.f32.xlu0 %v1706_v28  ;;  %v1994_v28 = vld [vmem:[#allocation16 + $0x88] sm:$0xff] }
 0xdad   : > { %v2829_v30 = vpack.c.bf16 %v1994_v28, %v1993_v26  ;;  %v1986_v26 = vld [vmem:[#allocation16 + $0x48] sm:$0xff]  ;;  %v2877_v28 = vpack.c.bf16 %v2034_v24, %v2033_v22 }
 0xdae   : > { %v2847_v29 = vpack.c.bf16 %v1986_v26, %v1985_v25 }
 0xdaf   : > { %2830 = vmatprep.subr.bf16.mxu1 %v2829_v30  ;;  %v2017_v30 = vld [vmem:[#allocation16 + $0x140] sm:$0xff] }
 0xdb0   : > { %v2879_v32 = vpack.c.bf16 %v2018_v31, %v2017_v30 }
 0xe39   : > { %v1708_v34 = vpop.xlane.xlu0 %1707 }
 0xe3a   : > { %v1709_v35 = vmul.f32 0.0078125, %v1708_v34  ;;  %v2003_v34 = vld [vmem:[#allocation16 + $0xd0] sm:$0xff] }
 0xe3c   : > { %v1710_v36 = vadd.f32 1e-05, %v1709_v35  ;;  %v2004_v35 = vld [vmem:[#allocation16 + $0xd8] sm:$0xff] }
 0xe3e   : > { %3126 = vrsqrt.f32 %v1710_v36  ;;  %v2035_v36 = vld [vmem:[#allocation16 + $0x1d0] sm:$0xff] }
 0xe48   : > { %v3127_v38 = vpop.eup %3126 }
 0xe49   : > { %v1712_v42 = vmul.f32 %v3127_v38, %v4045_v27  ;;  %v2030_v27 = vld [vmem:[#allocation16 + $0x1a8] sm:$0xff]  ;;  %v2036_v38 = vld [vmem:[#allocation16 + $0x1d8] sm:$0xff] }
 0xe4a   : > { %v2869_v0 = vpack.c.bf16 %v2030_v27, %v2029_v59  ;;  %v2881_v41 = vpack.c.bf16 %v2036_v38, %v2035_v36  ;;  %v2857_v59 = vpack.c.bf16 %v2008_v44, %v2007_v58  ;;  %v2040_v27 = vld [vmem:[#allocation16 + $0x1f8] sm:$0xff] }
 0xe4b   : > { %v1720_v49 = vmul.f32 %v2394_v37, %v1712_v42  ;;  %v2849_v37 = vpack.c.bf16 %v2004_v35, %v2003_v34  ;;  %v2889_v62 = vpack.c.bf16 %v2040_v27, %v2039_v33 }
 0xe4d   : > { %v1728_v54 = vadd.f32 %v2395_v39, %v1720_v49  ;;  %v1987_v39 = vld [vmem:[#allocation16 + $0x50] sm:$0xff]  ;;  %v2853_v49 = vpack.c.bf16 %v2006_v47, %v2005_v46 }
 0xe4e   : > { %v2851_v42 = vpack.c.bf16 %v1988_v40, %v1987_v39 }
 0xe4f   : > { %1880 = vmatmul.mubr.f32.vlgmr.msra.gmra.mrb[16].mxu1 %v1728_v54  ;;  %1951 = vmatmul.mubr.f32.vlgmr.msra.gmra.mrb[4].mxu0 %v1728_v54 }
 0xe50   : > { %2832 = vmatpush3.bf16.msra.mxu1 %v2831_v50  ;;  %2864 = vmatpush3.bf16.msra.mxu0 %v2863_v14  ;;  %v2038_v50 = vld [vmem:[#allocation16 + $0x1e8] sm:$0xff]  ;;  %v1989_v14 = vld [vmem:[#allocation16 + $0x60] sm:$0xff] }
 0xe51   : > { %2834 = vmatprep.subr.bf16.mxu1 %v2833_v55  ;;  %2866 = vmatprep.subr.bf16.mxu0 %v2865_v56  ;;  %v2885_v53 = vpack.c.bf16 %v2038_v50, %v2037_v48  ;;  %v2855_v54 = vpack.c.bf16 %v1990_v51, %v1989_v14  ;;  %v2021_v55 = vld [vmem:[#allocation16 + $0x160] sm:$0xff]  ;;  %v2022_v56 = vld [vmem:[#allocation16 + $0x168] sm:$0xff] }
 0xe52   : > { %v2887_v57 = vpack.c.bf16 %v2022_v56, %v2021_v55  ;;  %v2396_v48 = vld [vmem:[%s4221_s16] ss:$0 sm:$0xff] }
 0xe54   : > { %2836 = vmatpush3.bf16.msra.mxu1 %v2835_v60  ;;  %2868 = vmatpush3.bf16.msra.mxu0 %v2867_v61  ;;  %v1991_v60 = vld [vmem:[#allocation16 + $0x70] sm:$0xff]  ;;  %v1992_v61 = vld [vmem:[#allocation16 + $0x78] sm:$0xff] }
 0xe55   : > { %2838 = vmatprep.subr.bf16.mxu1 %v2837_v63  ;;  %2870 = vmatprep.subr.bf16.mxu0 %v2869_v0  ;;  %v2859_v63 = vpack.c.bf16 %v1992_v61, %v1991_v60  ;;  %v2023_v0 = vld [vmem:[#allocation16 + $0x170] sm:$0xff] }
 0xe56   : > { %v2891_v10 = vpack.c.bf16 %v2024_v1, %v2023_v0 }
 0xe58   : > { %2840 = vmatpush3.bf16.msra.mxu1 %v2839_v3  ;;  %2872 = vmatpush3.bf16.msra.mxu0 %v2871_v4  ;;  %v1796_v3 = vshrl.u32 %v1795_v2, 7 }
 0xe59   : > { %2842 = vmatprep.subr.bf16.mxu1 %v2841_v8  ;;  %2874 = vmatprep.subr.bf16.mxu0 %v2873_v15 }
 0xe5a   : > { %v1797_v4 = vsub.s32 0, %v1796_v3  ;;  %v1805_v5 = vsub.s32 2, %v1796_v3  ;;  %v1801_v7 = vsub.s32 1, %v1796_v3  ;;  %v1809_v8 = vsub.s32 3, %v1796_v3 }
 0xe5c   : > { %2844 = vmatpush3.bf16.msra.mxu1 %v2843_v16  ;;  %2876 = vmatpush3.bf16.msra.mxu0 %v2875_v20  ;;  %v1798_v9 = vrot.slane %v1793_v6, %v1797_v4  ;;  %v1806_v12 = vrot.slane %v1793_v6, %v1805_v5  ;;  %v1802_v13 = vrot.slane %v1793_v6, %v1801_v7 }
 0xe5d   : > { %2846 = vmatprep.subr.bf16.mxu1 %v2845_v23  ;;  %2878 = vmatprep.subr.bf16.mxu0 %v2877_v28  ;;  %v1810_v15 = vrot.slane %v1793_v6, %v1809_v8 }
 0xe60   : > { %2848 = vmatpush3.bf16.msra.mxu1 %v2847_v29  ;;  %2880 = vmatpush3.bf16.msra.mxu0 %v2879_v32 }
 0xe61   : > { %2850 = vmatprep.subr.bf16.mxu1 %v2849_v37  ;;  %2882 = vmatprep.subr.bf16.mxu0 %v2881_v41 }
 0xe64   : > { %2852 = vmatpush3.bf16.msra.mxu1 %v2851_v42  ;;  %2884 = vmatpush3.bf16.msra.mxu0 %v2883_v45 }
 0xe65   : > { %2854 = vmatprep.subr.bf16.mxu1 %v2853_v49  ;;  %2886 = vmatprep.subr.bf16.mxu0 %v2885_v53 }
 0xe68   : > { %2856 = vmatpush3.bf16.msra.mxu1 %v2855_v54  ;;  %2888 = vmatpush3.bf16.msra.mxu0 %v2887_v57 }
 0xe69   : > { %2858 = vmatprep.subr.bf16.mxu1 %v2857_v59  ;;  %2890 = vmatprep.subr.bf16.mxu0 %v2889_v62 }
 0xe6c   : > { %2860 = vmatpush3.bf16.msra.mxu1 %v2859_v63  ;;  %2892 = vmatpush3.bf16.msra.mxu0 %v2891_v10 }
 0xf22   : > { %v1881_v16 = vpop.f32.mrb[16].mxu1  ;;  %v1952_v18 = vpop.f32.mrb[4].mxu0 }
 0xf23   : > { %v1882_v19 = vadd.f32 %v1881_v16, %v1798_v9  ;;  %v1953_v20 = vadd.f32 %v1952_v18, %v1806_v12  ;;  %v1883_v21 = vpop.f32.mrb[17].mxu1  ;;  %v1954_v11 = vpop.f32.mrb[5].mxu0 }
 0xf24   : > { %v1884_v22 = vadd.f32 %v1883_v21, %v1802_v13  ;;  %v1955_v23 = vadd.f32 %v1954_v11, %v1810_v15 }
 0xf25   : > { %v1961_v24 = vmul.f32 0.70710677, %v1882_v19  ;;  %v1963_v25 = vmul.f32 0.70710677, %v1953_v20  ;;  %v1957_v38 = vmul.f32 0.5, %v1882_v19  ;;  %v1959_v41 = vmul.f32 0.5, %v1953_v20 }
 0xf26   : > { %v1962_v26 = vmul.f32 0.70710677, %v1884_v22  ;;  %v1964_v28 = vmul.f32 0.70710677, %v1955_v23  ;;  %v1958_v36 = vmul.f32 0.5, %v1884_v22  ;;  %v1960_v39 = vmul.f32 0.5, %v1955_v23 }
 0xf27   : > { %3128 = verf.f32 %v1961_v24 }
 0xf28   : > { %3130 = verf.f32 %v1963_v25 }
 0xf29   : > { %3132 = verf.f32 %v1962_v26 }
 0xf2a   : > { %3134 = verf.f32 %v1964_v28 }
 0xf31   : > { %v3129_v29 = vpop.eup %3128 }
 0xf32   : > { %v3131_v30 = vpop.eup %3130  ;;  %v1969_v32 = vadd.f32 1.0, %v3129_v29 }
 0xf33   : > { %v3133_v31 = vpop.eup %3132  ;;  %v1971_v35 = vadd.f32 1.0, %v3131_v30 }
 0xf34   : > { %v3135_v34 = vpop.eup %3134  ;;  %v1970_v37 = vadd.f32 1.0, %v3133_v31  ;;  %v1973_v17 = vmul.f32 %v1969_v32, %v1957_v38 }
 0xf35   : > { %v1972_v40 = vadd.f32 1.0, %v3135_v34  ;;  %v1975_v45 = vmul.f32 %v1971_v35, %v1959_v41 }
 0xf36   : > { %v1974_v42 = vmul.f32 %v1970_v37, %v1958_v36 }
 0xf37   : > { %v1976_v43 = vmul.f32 %v1972_v40, %v1960_v39 }
 0xf38   : > { %2112 = vmatprep.mubr.f32.mxu1 %v1974_v42 }
 0xf39   : > { %2182 = vmatprep.mubr.f32.mxu0 %v1976_v43  ;;  %2113 = vmatmul.mubr.f32.vlgmr.msra.gmra.mrb[18].mxu1 %v1973_v17 }
 0xf3a   : > { %2183 = vmatmul.mubr.f32.vlgmr.msra.gmra.mrb[6].mxu0 %v1975_v45 }
0x100c   : > { %v2493_v46 = vpop.f32.mrb[18].mxu1 }
0x100d   : > { %v2528_v47 = vpop.f32.mrb[6].mxu0  ;;  %v2494_v49 = vpop.f32.mrb[19].mxu1 }
0x100e   : > { %v2495_v50 = vadd.f32 %v2494_v49, %v2493_v46  ;;  %v2529_v14 = vpop.f32.mrb[7].mxu0 }
0x100f   : > { %v2530_v51 = vadd.f32 %v2529_v14, %v2528_v47 }
0x1010   : > { %v2115_v53 = vadd.f32 %v2495_v50, %v2396_v48 }
0x1012   : > { %v2185_v54 = vadd.f32 %v2530_v51, %v2115_v53 }
0x1014   : > { %v2188_v55 = vadd.f32 %v2185_v54, %v4041_v52 }
0x1016   : > { %2189 = vst [vmem:[%s594_s8] sm:$0xff] %v2188_v55 }
0x1017   : > { %3347 = shalt.err (!%p3344_p9)
}
0x1018   : > { %s3348_s26 = scalar_lea.hbm %s4070_s12, 128  ;;  %s3352_s29 = scalar_lea.hbm %s4224_s30, 512 }
0x1019   : > { %p3349_p11 = scmp.ne.s32.totalorder %s4070_s12, %s3348_s26  ;;  %p3353_p7 = scmp.lt.u32.totalorder %s4070_s12, %s4224_s30 }
0x101a   : > { %p3354_p12 = scmp.lt.u32.totalorder %s3352_s29, %s3348_s26  ;;  %p3356_p6 = scmp.lt.u32.totalorder %s3348_s26, %s4070_s12 }
0x101b   : > { %p3350_p2 = pnand %p3349_p11, %p4225_p10 }
0x101c   : > { %p3355_p1 = por %p3354_p12, %p3353_p7 }
0x101d   : > { %p3351_p4 = pneg %p3350_p2 }
0x101e   : > { %p3357_p13 = por %p3356_p6, %p3355_p1 }
0x1020   : > { %p3358_p3 = pnand %p3357_p13, %p3351_p4 }
0x1022   : > { %3361 = shalt.err (!%p3358_p3)
}
0x1023   : > { %2919 = dma.vmem_to_hbm [thread:$0]  (%p4225_p10), %s4072_s9, 128, %s4070_s12, %s2191_s24  }
0x1024 PF: > { %s4226_s16 = sld [smem:[#allocation28_spill]]  ;;  %s4227_s15 = sld [smem:[#allocation23_spill]] }
0x1025   : > { %s4228_s2 = sld [smem:[#allocation32_spill]] }
0x102a   : > { %p2959_p5 = scmp.ge.s32.totalorder %s4226_s16, 2  ;;  %s2218_s25 = sand.u32 1, %s4227_s15  }
0x102b   : > { %p4229_p8 = scmp.ne.s32.totalorder %s4228_s2, 0  ;;  %s2219_s28 = scalar_lea.sflag [#allocation7], %s2218_s25 }
0x102d   : > { %p2944_p0 = pnand %p2959_p5, %p4229_p8 }
0x102f   : > { %3427 = dma.done.wait (!%p2944_p0), %s2219_s28, 128  }
0x1030   : > { %3429 = vsyncadd (!%p2944_p0), %s2219_s28, 4294967168  ;;  %s32_s28 = sadd.s32 1, %s4226_s16   ;;  %s4230_s20 = sld [smem:[#allocation24_spill]] }
0x1031   : > { %p29_p9 = scmp.ge.s32.totalorder %s32_s28, 6   ;;  %s4231_s10 = sld [smem:[#allocation34_spill]] }
0x1032   : > { %s4232_s23 = sld [smem:[#allocation25_spill]]  ;;  %s4233_s9 = sld [smem:[#allocation33_spill]] }
0x1033   : > { %s4234_s24 = sld [smem:[#allocation26_spill]]  ;;  %s4235_s25 = sld [smem:[#allocation27_spill]] }
0x1034   : > { %s4236_s26 = sld [smem:[#allocation29_spill]]  ;;  %s4237_s27 = sld [smem:[#allocation30_spill]] }
0x1035   : > { %s4238_s18 = smov %s3436_s19  ;;  %s4241_s21 = smov %s3448_s22 }
0x1036   : > { %s4239_s19 = smov %s4230_s20  ;;  %31 = sbr.rel (!%p29_p9) target bundleno = 20 (0x14), region = 168 }
0x1037   : > { %s4240_s20 = smov %s4231_s10 }
0x1038   : > { %s4242_s22 = smov %s4232_s23  ;;  %s4243_s23 = smov %s4233_s9 }
0x103d   :  { %2224 = vsyncpa [#allocation6], 1 }
0x103e   :  { %2226 = vsyncpa [#allocation6 + $0x1], 1 }
0x103f   :  { %2227 = vsyncpa [#allocation9], 1 }
0x1040   :  { %2228 = vsyncpa [#allocation12], 1 }
0x1041   :  { %2229 = vsyncpa [#allocation15], 1 }
0x1042   :  { %2230 = vsyncpa [#allocation7], 1 }
0x1043   :  { %2232 = vsyncpa [#allocation7 + $0x1], 1 }

</bundles_post_ra>
